<compile_context>
chip_gen: v5e
topology: v5e:2x2
jax: 0.10.0
libtpu: 0.0.40
codegen_flags: <defaults>
</compile_context>

<pallas_src>
import functools

import jax
import jax.numpy as jnp
from jax import lax
from jax.experimental import pallas as pl
from jax.experimental.pallas import tpu as pltpu


# ---------------------------------------------------------------------------
# Host-side parameter packing (runs once, outside the kernel)
# ---------------------------------------------------------------------------
def _banded_conv_weights(w, scale, bias, F, pool):
    """Fold Conv2d(3x3,'same') + BatchNorm into per-dy banded matmul weights.

    Activation lane layout: lane = c*F + f (channel-major, unpadded along F —
    the 'same' zero padding along F is folded into the band).  Output columns
    are permuted so the pool phase p (f = fk*pool + p) is the OUTER lane slab:
      new column = p*(Cout*Fk) + co*Fk + fk
    so MaxPool(1, pool) becomes a max over `pool` contiguous lane slices and
    the pooled result is already in the next stage's input layout.
    """
    Cout, Cin, _, _ = w.shape
    Fk = F // pool
    g = jnp.arange(F)                      # input freq within a channel block
    f = jnp.arange(F)                      # output freq within a channel block
    per_dy = []
    for dy in range(3):
        Wd = jnp.zeros((Cin, F, Cout, F), jnp.float32)
        for dx in range(3):
            band = (g[:, None] == (f[None, :] - 1 + dx)).astype(jnp.float32)
            wt = jnp.transpose(w[:, :, dy, dx])            # (Cin, Cout)
            Wd = Wd + band[None, :, None, :] * wt[:, None, :, None]
        per_dy.append(Wd.reshape(Cin * F, Cout * F))
    W = jnp.stack(per_dy, axis=0)                          # (3, Cin*F, Cout*F)
    # permute output columns: (p, co, fk)  <-  old column co*F + fk*pool + p
    p_i = jnp.arange(pool)[:, None, None]
    c_i = jnp.arange(Cout)[None, :, None]
    k_i = jnp.arange(Fk)[None, None, :]
    old_cols = (c_i * F + k_i * pool + p_i).reshape(-1)    # (Cout*F,)
    W = W[:, :, old_cols]
    s_vec = jnp.repeat(scale, F)[old_cols][None, :]        # (1, Cout*F)
    b_vec = jnp.repeat(bias, F)[old_cols][None, :]
    return W, s_vec, b_vec


def _pack_gru(raw):
    """Pack a PyTorch-layout bidirectional GRU for the fused kernel.

    Gate columns are interleaved per gate: [r_f, r_b, z_f, z_b, n_f, n_b]
    (each H wide).  whh is block-diagonal per direction so the interleaved
    (1, 2H) state [h_f | h_b] needs a single matmul per step.
    """
    H = raw['gru_whh_f'].shape[1]

    def interleave(a_f, a_b):
        parts = []
        for g in range(3):                 # r, z, n
            parts.append(a_f[..., g * H:(g + 1) * H])
            parts.append(a_b[..., g * H:(g + 1) * H])
        return jnp.concatenate(parts, axis=-1)

    wih = interleave(raw['gru_wih_f'].T, raw['gru_wih_b'].T)              # (D, 6H)
    bih = interleave(raw['gru_bih_f'][None, :], raw['gru_bih_b'][None, :])
    bhh = interleave(raw['gru_bhh_f'][None, :], raw['gru_bhh_b'][None, :])
    whh_f = raw['gru_whh_f'].T            # (H, 3H)
    whh_b = raw['gru_whh_b'].T
    zeros = jnp.zeros((H, H), jnp.float32)
    blocks = []
    for g in range(3):
        blocks.append(jnp.concatenate([whh_f[:, g * H:(g + 1) * H], zeros], axis=0))
        blocks.append(jnp.concatenate([zeros, whh_b[:, g * H:(g + 1) * H]], axis=0))
    whh = jnp.concatenate(blocks, axis=1)                                  # (2H, 6H)
    gmask = ((jnp.arange(6 * H) // H) % 2 == 0).astype(jnp.float32)[None, :]
    return wih, bih, whh, bhh, gmask


def pack_params(raw, F0, pools=(5, 2, 2)):
    p = {}
    F = F0
    for i, pool in zip((1, 2, 3), pools):
        # General BN folding: scale = gamma/sqrt(var+eps); bias includes conv
        # bias, running mean and beta (fixes the "default-init only" concern).
        scale = raw[f'bn{i}_g'] / jnp.sqrt(raw[f'bn{i}_v'] + 1e-5)
        bias = raw[f'bn{i}_b'] + scale * (raw[f'conv{i}_b'] - raw[f'bn{i}_m'])
        W, s_vec, b_vec = _banded_conv_weights(raw[f'conv{i}_w'], scale, bias, F, pool)
        p[f'W{i}'], p[f's{i}'], p[f'b{i}'] = W, s_vec, b_vec
        F = F // pool
    p['wih'], p['bih'], p['whh'], p['bhh'], p['gmask'] = _pack_gru(raw)
    p['lw1'] = raw['lin1_w'].T
    p['lb1'] = raw['lin1_b'][None, :]
    p['lw2'] = raw['lin2_w'].T
    p['lb2'] = raw['lin2_b'][None, :]
    return p


# ---------------------------------------------------------------------------
# The fused Pallas kernel: conv stack + biGRU + linear1/linear2
# ---------------------------------------------------------------------------
def _crnn_kernel(x_ref,
                 w1_ref, s1_ref, b1_ref,
                 w2_ref, s2_ref, b2_ref,
                 w3_ref, s3_ref, b3_ref,
                 wih_ref, bih_ref, whh_ref, bhh_ref, gmask_ref,
                 lw1_ref, lb1_ref, lw2_ref, lb2_ref,
                 o_ref,
                 pad1, pad2, pad3, gi_s, outf_s, outb_s,
                 *, T, H, pools):
    f32 = jnp.float32

    # ---- Conv3x3 + folded BN + ReLU + MaxPool(1, pool), three fused stages ----
    def conv_stage(pad_ref, w_ref, s_ref, b_ref, pool):
        acc = jnp.dot(pad_ref[0:T, :], w_ref[0], preferred_element_type=f32)
        acc = acc + jnp.dot(pad_ref[1:T + 1, :], w_ref[1], preferred_element_type=f32)
        acc = acc + jnp.dot(pad_ref[2:T + 2, :], w_ref[2], preferred_element_type=f32)
        y = jnp.maximum(acc * s_ref[...] + b_ref[...], 0.0)   # (T, pool*Wk)
        wk = y.shape[1] // pool
        # Pool phase is the outermost lane slab -> max over contiguous slices.
        pooled = y[:, 0:wk]
        for p in range(1, pool):
            pooled = jnp.maximum(pooled, y[:, p * wk:(p + 1) * wk])
        return pooled                                          # (T, Wk)

    pad1[...] = jnp.zeros_like(pad1)         # 'same' padding in time (rows 0, T+1)
    pad1[1:T + 1, :] = x_ref[0]
    h1 = conv_stage(pad1, w1_ref, s1_ref, b1_ref, pools[0])

    pad2[...] = jnp.zeros_like(pad2)
    pad2[1:T + 1, :] = h1
    h2 = conv_stage(pad2, w2_ref, s2_ref, b2_ref, pools[1])

    pad3[...] = jnp.zeros_like(pad3)
    pad3[1:T + 1, :] = h2
    feats = conv_stage(pad3, w3_ref, s3_ref, b3_ref, pools[2])   # (T, D) GRU input

    # ---- bidirectional GRU ----
    # Hoisted input projection: one matmul for both directions, all timesteps.
    gi_s[...] = jnp.dot(feats, wih_ref[...], preferred_element_type=f32) + bih_ref[...]

    whh = whh_ref[...]            # (2H, 6H) block-diagonal per direction
    bhh = bhh_ref[...]            # (1, 6H)
    gmask = gmask_ref[...]        # (1, 6H): 1.0 on forward-direction gate columns

    def step(s, h):               # h: (1, 2H) = [h_fwd | h_bwd], directions interleaved
        tf = s
        tb = T - 1 - s
        gi_f = gi_s[pl.ds(tf, 1), :]                  # (1, 6H)
        gi_b = gi_s[pl.ds(tb, 1), :]
        gi = gmask * gi_f + (1.0 - gmask) * gi_b      # fwd cols from tf, bwd from tb
        gh = jnp.dot(h, whh, preferred_element_type=f32) + bhh
        r = jax.nn.sigmoid(gi[:, 0:2 * H] + gh[:, 0:2 * H])
        z = jax.nn.sigmoid(gi[:, 2 * H:4 * H] + gh[:, 2 * H:4 * H])
        n = jnp.tanh(gi[:, 4 * H:6 * H] + r * gh[:, 4 * H:6 * H])
        h_new = (1.0 - z) * n + z * h
        outf_s[pl.ds(tf, 1), :] = h_new[:, 0:H]       # fwd hidden for time tf
        outb_s[pl.ds(tb, 1), :] = h_new[:, H:2 * H]   # bwd hidden for time tb
        return h_new

    h0 = jnp.zeros((1, 2 * H), f32)
    _ = lax.fori_loop(0, T, step, h0, unroll=(T <= 32))

    # ---- linear1 -> linear2 epilogue (no activation between, as in the module) ----
    rec = jnp.concatenate([outf_s[...], outb_s[...]], axis=1)     # (T, 2H)
    hid = jnp.dot(rec, lw1_ref[...], preferred_element_type=f32) + lb1_ref[...]
    out = jnp.dot(hid, lw2_ref[...], preferred_element_type=f32) + lb2_ref[...]
    o_ref[0] = out


def crnn_forward(x, p, *, C, H, ncls, pools=(5, 2, 2)):
    B, T, F0 = x.shape
    F1 = F0 // pools[0]
    F2 = F1 // pools[1]

    def full_spec(a):
        return pl.BlockSpec(a.shape, lambda b, _nd=a.ndim: (0,) * _nd)

    kernel = functools.partial(_crnn_kernel, T=T, H=H, pools=pools)

    weights = (p['W1'], p['s1'], p['b1'],
               p['W2'], p['s2'], p['b2'],
               p['W3'], p['s3'], p['b3'],
               p['wih'], p['bih'], p['whh'], p['bhh'], p['gmask'],
               p['lw1'], p['lb1'], p['lw2'], p['lb2'])

    return pl.pallas_call(
        kernel,
        out_shape=jax.ShapeDtypeStruct((B, T, ncls), jnp.float32),
        grid=(B,),
        in_specs=[pl.BlockSpec((1, T, F0), lambda b: (b, 0, 0))] +
                 [full_spec(w) for w in weights],
        out_specs=pl.BlockSpec((1, T, ncls), lambda b: (b, 0, 0)),
        scratch_shapes=[
            pltpu.VMEM((T + 2, 1 * F0), jnp.float32),   # time-padded stage-1 input
            pltpu.VMEM((T + 2, C * F1), jnp.float32),   # time-padded stage-2 input
            pltpu.VMEM((T + 2, C * F2), jnp.float32),   # time-padded stage-3 input
            pltpu.VMEM((T, 6 * H), jnp.float32),        # hoisted GRU input gates
            pltpu.VMEM((T, H), jnp.float32),            # forward hidden states
            pltpu.VMEM((T, H), jnp.float32),            # backward hidden states
        ],
        compiler_params=pltpu.CompilerParams(
            dimension_semantics=("parallel",),          # batch shards across TCs (v7x)
            vmem_limit_bytes=32 * 1024 * 1024,
        ),
    )(x, *weights)


# ---------------------------------------------------------------------------
# Deterministic PyTorch-layout parameter init + pure-JAX reference (for checking)
# ---------------------------------------------------------------------------
def init_raw_params(key, C, H, ncls, d_in):
    it = iter(jax.random.split(key, 32))

    def u(shape, s=0.2):
        return jax.random.uniform(next(it), shape, jnp.float32, -s, s)

    raw = {}
    raw['conv1_w'] = u((C, 1, 3, 3)); raw['conv1_b'] = u((C,))
    raw['conv2_w'] = u((C, C, 3, 3)); raw['conv2_b'] = u((C,))
    raw['conv3_w'] = u((C, C, 3, 3)); raw['conv3_b'] = u((C,))
    for i in (1, 2, 3):                     # non-trivial BN stats (general folding)
        raw[f'bn{i}_g'] = 1.0 + u((C,))
        raw[f'bn{i}_b'] = u((C,), 0.1)
        raw[f'bn{i}_m'] = u((C,), 0.1)
        raw[f'bn{i}_v'] = 1.0 + u((C,))
    raw['gru_wih_f'] = u((3 * H, d_in)); raw['gru_whh_f'] = u((3 * H, H))
    raw['gru_bih_f'] = u((3 * H,));      raw['gru_bhh_f'] = u((3 * H,))
    raw['gru_wih_b'] = u((3 * H, d_in)); raw['gru_whh_b'] = u((3 * H, H))
    raw['gru_bih_b'] = u((3 * H,));      raw['gru_bhh_b'] = u((3 * H,))
    raw['lin1_w'] = u((H, 2 * H)); raw['lin1_b'] = u((H,))
    raw['lin2_w'] = u((ncls, H));  raw['lin2_b'] = u((ncls,))
    return raw


def reference_forward(x, raw, pools):
    """Plain-jnp re-implementation mirroring the PyTorch module (eval mode)."""
    def conv_bn_relu_pool(h, w, b, gamma, beta, mean, var, pool):
        B, Cin, T, F = h.shape
        hp = jnp.pad(h, ((0, 0), (0, 0), (1, 1), (1, 1)))
        out = jnp.zeros((B, w.shape[0], T, F), jnp.float32)
        for dy in range(3):
            for dx in range(3):
                patch = hp[:, :, dy:dy + T, dx:dx + F]
                out = out + jnp.einsum('bctf,oc->botf', patch, w[:, :, dy, dx])
        out = out + b[None, :, None, None]
        scale = gamma / jnp.sqrt(var + 1e-5)
        shift = beta - scale * mean
        out = scale[None, :, None, None] * out + shift[None, :, None, None]
        out = jnp.maximum(out, 0.0)
        Fk = F // pool
        return out.reshape(B, w.shape[0], T, Fk, pool).max(axis=-1)

    h = x[:, None, :, :]
    for i, pool in zip((1, 2, 3), pools):
        h = conv_bn_relu_pool(h, raw[f'conv{i}_w'], raw[f'conv{i}_b'],
                              raw[f'bn{i}_g'], raw[f'bn{i}_b'],
                              raw[f'bn{i}_m'], raw[f'bn{i}_v'], pool)
    B, C, T, F3 = h.shape
    feats = jnp.transpose(h, (0, 2, 1, 3)).reshape(B, T, C * F3)

    H = raw['gru_whh_f'].shape[1]

    def gru_dir(wih, whh, bih, bhh, reverse):
        hs = jnp.zeros((B, H), jnp.float32)
        outs = [None] * T
        order = range(T - 1, -1, -1) if reverse else range(T)
        for t in order:
            xt = feats[:, t, :]
            gi = xt @ wih.T + bih
            gh = hs @ whh.T + bhh
            r = jax.nn.sigmoid(gi[:, :H] + gh[:, :H])
            z = jax.nn.sigmoid(gi[:, H:2 * H] + gh[:, H:2 * H])
            n = jnp.tanh(gi[:, 2 * H:] + r * gh[:, 2 * H:])
            hs = (1.0 - z) * n + z * hs
            outs[t] = hs
        return jnp.stack(outs, axis=1)

    fwd = gru_dir(raw['gru_wih_f'], raw['gru_whh_f'],
                  raw['gru_bih_f'], raw['gru_bhh_f'], False)
    bwd = gru_dir(raw['gru_wih_b'], raw['gru_whh_b'],
                  raw['gru_bih_b'], raw['gru_bhh_b'], True)
    rec = jnp.concatenate([fwd, bwd], axis=-1)
    y = rec @ raw['lin1_w'].T + raw['lin1_b']
    y = y @ raw['lin2_w'].T + raw['lin2_b']
    return y


if __name__ == "__main__":
    B, T, F0 = 2, 8, 60          # 60 -> /5 -> /2 -> /2 = 3 freq bins = 3*C GRU input
    C, H, NCLS = 4, 32, 5        # cnn_filters, rnn_hid, classes_num
    POOLS = (5, 2, 2)
    assert F0 // (POOLS[0] * POOLS[1] * POOLS[2]) == 3

    root = jax.random.PRNGKey(0)
    kx, kp = jax.random.split(root)
    x = jax.random.normal(kx, (B, T, F0), jnp.float32)
    raw = init_raw_params(kp, C, H, NCLS, d_in=3 * C)
    packed = pack_params(raw, F0, POOLS)

    fwd_fn = jax.jit(functools.partial(crnn_forward, C=C, H=H, ncls=NCLS, pools=POOLS))
    out = jax.block_until_ready(fwd_fn(x, packed))
    assert out.shape == (B, T, NCLS), out.shape

    ref = jax.block_until_ready(reference_forward(x, raw, POOLS))
    assert bool(jnp.allclose(out, ref, rtol=3e-2, atol=3e-2)), (
        float(jnp.max(jnp.abs(out - ref))))
    print("KERNEL_OK")
</pallas_src>

<mosaic_0001>
module attributes {stable_mosaic.version = 11 : i64} {
  func.func @_crnn_kernel(%arg0: i32, %arg1: memref<1x8x60xf32, #tpu.memory_space<vmem>>, %arg2: memref<3x60x240xf32, #tpu.memory_space<vmem>>, %arg3: memref<1x240xf32, #tpu.memory_space<vmem>>, %arg4: memref<1x240xf32, #tpu.memory_space<vmem>>, %arg5: memref<3x48x48xf32, #tpu.memory_space<vmem>>, %arg6: memref<1x48xf32, #tpu.memory_space<vmem>>, %arg7: memref<1x48xf32, #tpu.memory_space<vmem>>, %arg8: memref<3x24x24xf32, #tpu.memory_space<vmem>>, %arg9: memref<1x24xf32, #tpu.memory_space<vmem>>, %arg10: memref<1x24xf32, #tpu.memory_space<vmem>>, %arg11: memref<12x192xf32, #tpu.memory_space<vmem>>, %arg12: memref<1x192xf32, #tpu.memory_space<vmem>>, %arg13: memref<64x192xf32, #tpu.memory_space<vmem>>, %arg14: memref<1x192xf32, #tpu.memory_space<vmem>>, %arg15: memref<1x192xf32, #tpu.memory_space<vmem>>, %arg16: memref<64x32xf32, #tpu.memory_space<vmem>>, %arg17: memref<1x32xf32, #tpu.memory_space<vmem>>, %arg18: memref<32x5xf32, #tpu.memory_space<vmem>>, %arg19: memref<1x5xf32, #tpu.memory_space<vmem>>, %arg20: memref<1x8x5xf32, #tpu.memory_space<vmem>>, %arg21: memref<10x60xf32, #tpu.memory_space<vmem>>, %arg22: memref<10x48xf32, #tpu.memory_space<vmem>>, %arg23: memref<10x24xf32, #tpu.memory_space<vmem>>, %arg24: memref<8x192xf32, #tpu.memory_space<vmem>>, %arg25: memref<8x32xf32, #tpu.memory_space<vmem>>, %arg26: memref<8x32xf32, #tpu.memory_space<vmem>>) attributes {dimension_semantics = [#tpu.dimension_semantics<parallel>], iteration_bounds = array<i64: 2>, scalar_prefetch = 0 : i64, scratch_operands = 6 : i64, tpu.core_type = #tpu.core_type<tc>, window_params = [{transform_indices = @transform_0, window_bounds = array<i64: 1, 8, 60>}, {pipeline_mode = #tpu.pipeline_mode<synchronous>, transform_indices = @transform_1, window_bounds = array<i64: 3, 60, 240>}, {pipeline_mode = #tpu.pipeline_mode<synchronous>, transform_indices = @transform_2, window_bounds = array<i64: 1, 240>}, {pipeline_mode = #tpu.pipeline_mode<synchronous>, transform_indices = @transform_3, window_bounds = array<i64: 1, 240>}, {pipeline_mode = #tpu.pipeline_mode<synchronous>, transform_indices = @transform_4, window_bounds = array<i64: 3, 48, 48>}, {pipeline_mode = #tpu.pipeline_mode<synchronous>, transform_indices = @transform_5, window_bounds = array<i64: 1, 48>}, {pipeline_mode = #tpu.pipeline_mode<synchronous>, transform_indices = @transform_6, window_bounds = array<i64: 1, 48>}, {pipeline_mode = #tpu.pipeline_mode<synchronous>, transform_indices = @transform_7, window_bounds = array<i64: 3, 24, 24>}, {pipeline_mode = #tpu.pipeline_mode<synchronous>, transform_indices = @transform_8, window_bounds = array<i64: 1, 24>}, {pipeline_mode = #tpu.pipeline_mode<synchronous>, transform_indices = @transform_9, window_bounds = array<i64: 1, 24>}, {pipeline_mode = #tpu.pipeline_mode<synchronous>, transform_indices = @transform_10, window_bounds = array<i64: 12, 192>}, {pipeline_mode = #tpu.pipeline_mode<synchronous>, transform_indices = @transform_11, window_bounds = array<i64: 1, 192>}, {pipeline_mode = #tpu.pipeline_mode<synchronous>, transform_indices = @transform_12, window_bounds = array<i64: 64, 192>}, {pipeline_mode = #tpu.pipeline_mode<synchronous>, transform_indices = @transform_13, window_bounds = array<i64: 1, 192>}, {pipeline_mode = #tpu.pipeline_mode<synchronous>, transform_indices = @transform_14, window_bounds = array<i64: 1, 192>}, {pipeline_mode = #tpu.pipeline_mode<synchronous>, transform_indices = @transform_15, window_bounds = array<i64: 64, 32>}, {pipeline_mode = #tpu.pipeline_mode<synchronous>, transform_indices = @transform_16, window_bounds = array<i64: 1, 32>}, {pipeline_mode = #tpu.pipeline_mode<synchronous>, transform_indices = @transform_17, window_bounds = array<i64: 32, 5>}, {pipeline_mode = #tpu.pipeline_mode<synchronous>, transform_indices = @transform_18, window_bounds = array<i64: 1, 5>}, {transform_indices = @transform_19, window_bounds = array<i64: 1, 8, 5>}]} {
    %cst = arith.constant 0.000000e+00 : f32
    %0 = vector.broadcast %cst : f32 to vector<10x60xf32>
    %c0 = arith.constant 0 : index
    %c0_0 = arith.constant 0 : index
    %1 = vector.load %arg21[%c0, %c0_0] : memref<10x60xf32, #tpu.memory_space<vmem>>, vector<10x60xf32>
    tpu.vector_store %arg21[%c0, %c0_0], %0 {strides = array<i32>} : memref<10x60xf32, #tpu.memory_space<vmem>>, vector<10x60xf32>,
    %c0_1 = arith.constant 0 : index
    %c0_2 = arith.constant 0 : index
    %c0_3 = arith.constant 0 : index
    %2 = vector.load %arg1[%c0_1, %c0_2, %c0_3] : memref<1x8x60xf32, #tpu.memory_space<vmem>>, vector<1x8x60xf32>
    %3 = vector.shape_cast %2 : vector<1x8x60xf32> to vector<8x60xf32>
    %c1 = arith.constant 1 : index
    %c0_4 = arith.constant 0 : index
    %4 = vector.load %arg21[%c1, %c0_4] : memref<10x60xf32, #tpu.memory_space<vmem>>, vector<8x60xf32>
    tpu.vector_store %arg21[%c1, %c0_4], %3 {strides = array<i32>} : memref<10x60xf32, #tpu.memory_space<vmem>>, vector<8x60xf32>,
    %c0_5 = arith.constant 0 : index
    %c0_6 = arith.constant 0 : index
    %5 = vector.load %arg21[%c0_5, %c0_6] : memref<10x60xf32, #tpu.memory_space<vmem>>, vector<8x60xf32>
    %c0_7 = arith.constant 0 : index
    %c0_8 = arith.constant 0 : index
    %c0_9 = arith.constant 0 : index
    %6 = vector.load %arg2[%c0_7, %c0_8, %c0_9] : memref<3x60x240xf32, #tpu.memory_space<vmem>>, vector<1x60x240xf32>
    %7 = vector.shape_cast %6 : vector<1x60x240xf32> to vector<60x240xf32>
    %cst_10 = arith.constant dense<0.000000e+00> : vector<8x240xf32>
    %8 = tpu.matmul %5, %7, %cst_10 {dimension_numbers = #tpu.dot_dimension_numbers<[1], [0], [0], [1], [0, 0, 1, 1], [], []>} : vector<8x60xf32>, vector<60x240xf32>, vector<8x240xf32> -> vector<8x240xf32>
    %c1_11 = arith.constant 1 : index
    %c0_12 = arith.constant 0 : index
    %9 = vector.load %arg21[%c1_11, %c0_12] : memref<10x60xf32, #tpu.memory_space<vmem>>, vector<8x60xf32>
    %c1_13 = arith.constant 1 : index
    %c0_14 = arith.constant 0 : index
    %c0_15 = arith.constant 0 : index
    %10 = vector.load %arg2[%c1_13, %c0_14, %c0_15] : memref<3x60x240xf32, #tpu.memory_space<vmem>>, vector<1x60x240xf32>
    %11 = vector.shape_cast %10 : vector<1x60x240xf32> to vector<60x240xf32>
    %cst_16 = arith.constant dense<0.000000e+00> : vector<8x240xf32>
    %12 = tpu.matmul %9, %11, %cst_16 {dimension_numbers = #tpu.dot_dimension_numbers<[1], [0], [0], [1], [0, 0, 1, 1], [], []>} : vector<8x60xf32>, vector<60x240xf32>, vector<8x240xf32> -> vector<8x240xf32>
    %13 = arith.addf %8, %12 : vector<8x240xf32>
    %c2 = arith.constant 2 : index
    %c0_17 = arith.constant 0 : index
    %14 = vector.load %arg21[%c2, %c0_17] : memref<10x60xf32, #tpu.memory_space<vmem>>, vector<8x60xf32>
    %c2_18 = arith.constant 2 : index
    %c0_19 = arith.constant 0 : index
    %c0_20 = arith.constant 0 : index
    %15 = vector.load %arg2[%c2_18, %c0_19, %c0_20] : memref<3x60x240xf32, #tpu.memory_space<vmem>>, vector<1x60x240xf32>
    %16 = vector.shape_cast %15 : vector<1x60x240xf32> to vector<60x240xf32>
    %cst_21 = arith.constant dense<0.000000e+00> : vector<8x240xf32>
    %17 = tpu.matmul %14, %16, %cst_21 {dimension_numbers = #tpu.dot_dimension_numbers<[1], [0], [0], [1], [0, 0, 1, 1], [], []>} : vector<8x60xf32>, vector<60x240xf32>, vector<8x240xf32> -> vector<8x240xf32>
    %18 = arith.addf %13, %17 : vector<8x240xf32>
    %c0_22 = arith.constant 0 : index
    %c0_23 = arith.constant 0 : index
    %19 = vector.load %arg3[%c0_22, %c0_23] : memref<1x240xf32, #tpu.memory_space<vmem>>, vector<1x240xf32>
    %20 = vector.broadcast %19 : vector<1x240xf32> to vector<8x240xf32>
    %21 = arith.mulf %18, %20 : vector<8x240xf32>
    %c0_24 = arith.constant 0 : index
    %c0_25 = arith.constant 0 : index
    %22 = vector.load %arg4[%c0_24, %c0_25] : memref<1x240xf32, #tpu.memory_space<vmem>>, vector<1x240xf32>
    %23 = vector.broadcast %22 : vector<1x240xf32> to vector<8x240xf32>
    %24 = arith.addf %21, %23 : vector<8x240xf32>
    %cst_26 = arith.constant 0.000000e+00 : f32
    %25 = vector.broadcast %cst_26 : f32 to vector<8x240xf32>
    %26 = arith.maximumf %24, %25 : vector<8x240xf32>
    %27 = vector.extract_strided_slice %26 {offsets = [0, 0], sizes = [8, 48], strides = [1, 1]} : vector<8x240xf32> to vector<8x48xf32>
    %28 = vector.extract_strided_slice %26 {offsets = [0, 48], sizes = [8, 48], strides = [1, 1]} : vector<8x240xf32> to vector<8x48xf32>
    %29 = arith.maximumf %27, %28 : vector<8x48xf32>
    %30 = vector.extract_strided_slice %26 {offsets = [0, 96], sizes = [8, 48], strides = [1, 1]} : vector<8x240xf32> to vector<8x48xf32>
    %31 = arith.maximumf %29, %30 : vector<8x48xf32>
    %32 = vector.extract_strided_slice %26 {offsets = [0, 144], sizes = [8, 48], strides = [1, 1]} : vector<8x240xf32> to vector<8x48xf32>
    %33 = arith.maximumf %31, %32 : vector<8x48xf32>
    %34 = vector.extract_strided_slice %26 {offsets = [0, 192], sizes = [8, 48], strides = [1, 1]} : vector<8x240xf32> to vector<8x48xf32>
    %35 = arith.maximumf %33, %34 : vector<8x48xf32>
    %cst_27 = arith.constant 0.000000e+00 : f32
    %36 = vector.broadcast %cst_27 : f32 to vector<10x48xf32>
    %c0_28 = arith.constant 0 : index
    %c0_29 = arith.constant 0 : index
    %37 = vector.load %arg22[%c0_28, %c0_29] : memref<10x48xf32, #tpu.memory_space<vmem>>, vector<10x48xf32>
    tpu.vector_store %arg22[%c0_28, %c0_29], %36 {strides = array<i32>} : memref<10x48xf32, #tpu.memory_space<vmem>>, vector<10x48xf32>,
    %c1_30 = arith.constant 1 : index
    %c0_31 = arith.constant 0 : index
    %38 = vector.load %arg22[%c1_30, %c0_31] : memref<10x48xf32, #tpu.memory_space<vmem>>, vector<8x48xf32>
    tpu.vector_store %arg22[%c1_30, %c0_31], %35 {strides = array<i32>} : memref<10x48xf32, #tpu.memory_space<vmem>>, vector<8x48xf32>,
    %c0_32 = arith.constant 0 : index
    %c0_33 = arith.constant 0 : index
    %39 = vector.load %arg22[%c0_32, %c0_33] : memref<10x48xf32, #tpu.memory_space<vmem>>, vector<8x48xf32>
    %c0_34 = arith.constant 0 : index
    %c0_35 = arith.constant 0 : index
    %c0_36 = arith.constant 0 : index
    %40 = vector.load %arg5[%c0_34, %c0_35, %c0_36] : memref<3x48x48xf32, #tpu.memory_space<vmem>>, vector<1x48x48xf32>
    %41 = vector.shape_cast %40 : vector<1x48x48xf32> to vector<48x48xf32>
    %cst_37 = arith.constant dense<0.000000e+00> : vector<8x48xf32>
    %42 = tpu.matmul %39, %41, %cst_37 {dimension_numbers = #tpu.dot_dimension_numbers<[1], [0], [0], [1], [0, 0, 1, 1], [], []>} : vector<8x48xf32>, vector<48x48xf32>, vector<8x48xf32> -> vector<8x48xf32>
    %c1_38 = arith.constant 1 : index
    %c0_39 = arith.constant 0 : index
    %43 = vector.load %arg22[%c1_38, %c0_39] : memref<10x48xf32, #tpu.memory_space<vmem>>, vector<8x48xf32>
    %c1_40 = arith.constant 1 : index
    %c0_41 = arith.constant 0 : index
    %c0_42 = arith.constant 0 : index
    %44 = vector.load %arg5[%c1_40, %c0_41, %c0_42] : memref<3x48x48xf32, #tpu.memory_space<vmem>>, vector<1x48x48xf32>
    %45 = vector.shape_cast %44 : vector<1x48x48xf32> to vector<48x48xf32>
    %cst_43 = arith.constant dense<0.000000e+00> : vector<8x48xf32>
    %46 = tpu.matmul %43, %45, %cst_43 {dimension_numbers = #tpu.dot_dimension_numbers<[1], [0], [0], [1], [0, 0, 1, 1], [], []>} : vector<8x48xf32>, vector<48x48xf32>, vector<8x48xf32> -> vector<8x48xf32>
    %47 = arith.addf %42, %46 : vector<8x48xf32>
    %c2_44 = arith.constant 2 : index
    %c0_45 = arith.constant 0 : index
    %48 = vector.load %arg22[%c2_44, %c0_45] : memref<10x48xf32, #tpu.memory_space<vmem>>, vector<8x48xf32>
    %c2_46 = arith.constant 2 : index
    %c0_47 = arith.constant 0 : index
    %c0_48 = arith.constant 0 : index
    %49 = vector.load %arg5[%c2_46, %c0_47, %c0_48] : memref<3x48x48xf32, #tpu.memory_space<vmem>>, vector<1x48x48xf32>
    %50 = vector.shape_cast %49 : vector<1x48x48xf32> to vector<48x48xf32>
    %cst_49 = arith.constant dense<0.000000e+00> : vector<8x48xf32>
    %51 = tpu.matmul %48, %50, %cst_49 {dimension_numbers = #tpu.dot_dimension_numbers<[1], [0], [0], [1], [0, 0, 1, 1], [], []>} : vector<8x48xf32>, vector<48x48xf32>, vector<8x48xf32> -> vector<8x48xf32>
    %52 = arith.addf %47, %51 : vector<8x48xf32>
    %c0_50 = arith.constant 0 : index
    %c0_51 = arith.constant 0 : index
    %53 = vector.load %arg6[%c0_50, %c0_51] : memref<1x48xf32, #tpu.memory_space<vmem>>, vector<1x48xf32>
    %54 = vector.broadcast %53 : vector<1x48xf32> to vector<8x48xf32>
    %55 = arith.mulf %52, %54 : vector<8x48xf32>
    %c0_52 = arith.constant 0 : index
    %c0_53 = arith.constant 0 : index
    %56 = vector.load %arg7[%c0_52, %c0_53] : memref<1x48xf32, #tpu.memory_space<vmem>>, vector<1x48xf32>
    %57 = vector.broadcast %56 : vector<1x48xf32> to vector<8x48xf32>
    %58 = arith.addf %55, %57 : vector<8x48xf32>
    %cst_54 = arith.constant 0.000000e+00 : f32
    %59 = vector.broadcast %cst_54 : f32 to vector<8x48xf32>
    %60 = arith.maximumf %58, %59 : vector<8x48xf32>
    %61 = vector.extract_strided_slice %60 {offsets = [0, 0], sizes = [8, 24], strides = [1, 1]} : vector<8x48xf32> to vector<8x24xf32>
    %62 = vector.extract_strided_slice %60 {offsets = [0, 24], sizes = [8, 24], strides = [1, 1]} : vector<8x48xf32> to vector<8x24xf32>
    %63 = arith.maximumf %61, %62 : vector<8x24xf32>
    %cst_55 = arith.constant 0.000000e+00 : f32
    %64 = vector.broadcast %cst_55 : f32 to vector<10x24xf32>
    %c0_56 = arith.constant 0 : index
    %c0_57 = arith.constant 0 : index
    %65 = vector.load %arg23[%c0_56, %c0_57] : memref<10x24xf32, #tpu.memory_space<vmem>>, vector<10x24xf32>
    tpu.vector_store %arg23[%c0_56, %c0_57], %64 {strides = array<i32>} : memref<10x24xf32, #tpu.memory_space<vmem>>, vector<10x24xf32>,
    %c1_58 = arith.constant 1 : index
    %c0_59 = arith.constant 0 : index
    %66 = vector.load %arg23[%c1_58, %c0_59] : memref<10x24xf32, #tpu.memory_space<vmem>>, vector<8x24xf32>
    tpu.vector_store %arg23[%c1_58, %c0_59], %63 {strides = array<i32>} : memref<10x24xf32, #tpu.memory_space<vmem>>, vector<8x24xf32>,
    %c0_60 = arith.constant 0 : index
    %c0_61 = arith.constant 0 : index
    %67 = vector.load %arg23[%c0_60, %c0_61] : memref<10x24xf32, #tpu.memory_space<vmem>>, vector<8x24xf32>
    %c0_62 = arith.constant 0 : index
    %c0_63 = arith.constant 0 : index
    %c0_64 = arith.constant 0 : index
    %68 = vector.load %arg8[%c0_62, %c0_63, %c0_64] : memref<3x24x24xf32, #tpu.memory_space<vmem>>, vector<1x24x24xf32>
    %69 = vector.shape_cast %68 : vector<1x24x24xf32> to vector<24x24xf32>
    %cst_65 = arith.constant dense<0.000000e+00> : vector<8x24xf32>
    %70 = tpu.matmul %67, %69, %cst_65 {dimension_numbers = #tpu.dot_dimension_numbers<[1], [0], [0], [1], [0, 0, 1, 1], [], []>} : vector<8x24xf32>, vector<24x24xf32>, vector<8x24xf32> -> vector<8x24xf32>
    %c1_66 = arith.constant 1 : index
    %c0_67 = arith.constant 0 : index
    %71 = vector.load %arg23[%c1_66, %c0_67] : memref<10x24xf32, #tpu.memory_space<vmem>>, vector<8x24xf32>
    %c1_68 = arith.constant 1 : index
    %c0_69 = arith.constant 0 : index
    %c0_70 = arith.constant 0 : index
    %72 = vector.load %arg8[%c1_68, %c0_69, %c0_70] : memref<3x24x24xf32, #tpu.memory_space<vmem>>, vector<1x24x24xf32>
    %73 = vector.shape_cast %72 : vector<1x24x24xf32> to vector<24x24xf32>
    %cst_71 = arith.constant dense<0.000000e+00> : vector<8x24xf32>
    %74 = tpu.matmul %71, %73, %cst_71 {dimension_numbers = #tpu.dot_dimension_numbers<[1], [0], [0], [1], [0, 0, 1, 1], [], []>} : vector<8x24xf32>, vector<24x24xf32>, vector<8x24xf32> -> vector<8x24xf32>
    %75 = arith.addf %70, %74 : vector<8x24xf32>
    %c2_72 = arith.constant 2 : index
    %c0_73 = arith.constant 0 : index
    %76 = vector.load %arg23[%c2_72, %c0_73] : memref<10x24xf32, #tpu.memory_space<vmem>>, vector<8x24xf32>
    %c2_74 = arith.constant 2 : index
    %c0_75 = arith.constant 0 : index
    %c0_76 = arith.constant 0 : index
    %77 = vector.load %arg8[%c2_74, %c0_75, %c0_76] : memref<3x24x24xf32, #tpu.memory_space<vmem>>, vector<1x24x24xf32>
    %78 = vector.shape_cast %77 : vector<1x24x24xf32> to vector<24x24xf32>
    %cst_77 = arith.constant dense<0.000000e+00> : vector<8x24xf32>
    %79 = tpu.matmul %76, %78, %cst_77 {dimension_numbers = #tpu.dot_dimension_numbers<[1], [0], [0], [1], [0, 0, 1, 1], [], []>} : vector<8x24xf32>, vector<24x24xf32>, vector<8x24xf32> -> vector<8x24xf32>
    %80 = arith.addf %75, %79 : vector<8x24xf32>
    %c0_78 = arith.constant 0 : index
    %c0_79 = arith.constant 0 : index
    %81 = vector.load %arg9[%c0_78, %c0_79] : memref<1x24xf32, #tpu.memory_space<vmem>>, vector<1x24xf32>
    %82 = vector.broadcast %81 : vector<1x24xf32> to vector<8x24xf32>
    %83 = arith.mulf %80, %82 : vector<8x24xf32>
    %c0_80 = arith.constant 0 : index
    %c0_81 = arith.constant 0 : index
    %84 = vector.load %arg10[%c0_80, %c0_81] : memref<1x24xf32, #tpu.memory_space<vmem>>, vector<1x24xf32>
    %85 = vector.broadcast %84 : vector<1x24xf32> to vector<8x24xf32>
    %86 = arith.addf %83, %85 : vector<8x24xf32>
    %cst_82 = arith.constant 0.000000e+00 : f32
    %87 = vector.broadcast %cst_82 : f32 to vector<8x24xf32>
    %88 = arith.maximumf %86, %87 : vector<8x24xf32>
    %89 = vector.extract_strided_slice %88 {offsets = [0, 0], sizes = [8, 12], strides = [1, 1]} : vector<8x24xf32> to vector<8x12xf32>
    %90 = vector.extract_strided_slice %88 {offsets = [0, 12], sizes = [8, 12], strides = [1, 1]} : vector<8x24xf32> to vector<8x12xf32>
    %91 = arith.maximumf %89, %90 : vector<8x12xf32>
    %c0_83 = arith.constant 0 : index
    %c0_84 = arith.constant 0 : index
    %92 = vector.load %arg11[%c0_83, %c0_84] : memref<12x192xf32, #tpu.memory_space<vmem>>, vector<12x192xf32>
    %cst_85 = arith.constant dense<0.000000e+00> : vector<8x192xf32>
    %93 = tpu.matmul %91, %92, %cst_85 {dimension_numbers = #tpu.dot_dimension_numbers<[1], [0], [0], [1], [0, 0, 1, 1], [], []>} : vector<8x12xf32>, vector<12x192xf32>, vector<8x192xf32> -> vector<8x192xf32>
    %c0_86 = arith.constant 0 : index
    %c0_87 = arith.constant 0 : index
    %94 = vector.load %arg12[%c0_86, %c0_87] : memref<1x192xf32, #tpu.memory_space<vmem>>, vector<1x192xf32>
    %95 = vector.broadcast %94 : vector<1x192xf32> to vector<8x192xf32>
    %96 = arith.addf %93, %95 : vector<8x192xf32>
    %c0_88 = arith.constant 0 : index
    %c0_89 = arith.constant 0 : index
    %97 = vector.load %arg24[%c0_88, %c0_89] : memref<8x192xf32, #tpu.memory_space<vmem>>, vector<8x192xf32>
    tpu.vector_store %arg24[%c0_88, %c0_89], %96 {strides = array<i32>} : memref<8x192xf32, #tpu.memory_space<vmem>>, vector<8x192xf32>,
    %c0_90 = arith.constant 0 : index
    %c0_91 = arith.constant 0 : index
    %98 = vector.load %arg13[%c0_90, %c0_91] : memref<64x192xf32, #tpu.memory_space<vmem>>, vector<64x192xf32>
    %c0_92 = arith.constant 0 : index
    %c0_93 = arith.constant 0 : index
    %99 = vector.load %arg14[%c0_92, %c0_93] : memref<1x192xf32, #tpu.memory_space<vmem>>, vector<1x192xf32>
    %c0_94 = arith.constant 0 : index
    %c0_95 = arith.constant 0 : index
    %100 = vector.load %arg15[%c0_94, %c0_95] : memref<1x192xf32, #tpu.memory_space<vmem>>, vector<1x192xf32>
    %cst_96 = arith.constant 0.000000e+00 : f32
    %101 = vector.broadcast %cst_96 : f32 to vector<1x64xf32>
    %c0_i32 = arith.constant 0 : i32
    %c7_i32 = arith.constant 7 : i32
    %102 = arith.subi %c7_i32, %c0_i32 : i32
    %103 = arith.index_cast %c0_i32 : i32 to index
    %c0_97 = arith.constant 0 : index
    %104 = vector.load %arg24[%103, %c0_97] : memref<8x192xf32, #tpu.memory_space<vmem>>, vector<1x192xf32>
    %105 = arith.index_cast %102 : i32 to index
    %c0_98 = arith.constant 0 : index
    %106 = vector.load %arg24[%105, %c0_98] : memref<8x192xf32, #tpu.memory_space<vmem>>, vector<1x192xf32>
    %107 = arith.mulf %100, %104 : vector<1x192xf32>
    %cst_99 = arith.constant 1.000000e+00 : f32
    %108 = vector.broadcast %cst_99 : f32 to vector<1x192xf32>
    %109 = arith.subf %108, %100 : vector<1x192xf32>
    %110 = arith.mulf %109, %106 : vector<1x192xf32>
    %111 = arith.addf %107, %110 : vector<1x192xf32>
    %cst_100 = arith.constant dense<0.000000e+00> : vector<1x192xf32>
    %112 = tpu.matmul %101, %98, %cst_100 {dimension_numbers = #tpu.dot_dimension_numbers<[1], [0], [0], [1], [0, 0, 1, 1], [], []>} : vector<1x64xf32>, vector<64x192xf32>, vector<1x192xf32> -> vector<1x192xf32>
    %113 = arith.addf %112, %99 : vector<1x192xf32>
    %114 = vector.extract_strided_slice %111 {offsets = [0, 0], sizes = [1, 64], strides = [1, 1]} : vector<1x192xf32> to vector<1x64xf32>
    %115 = vector.extract_strided_slice %113 {offsets = [0, 0], sizes = [1, 64], strides = [1, 1]} : vector<1x192xf32> to vector<1x64xf32>
    %116 = arith.addf %114, %115 : vector<1x64xf32>
    %117 = arith.negf %116 : vector<1x64xf32>
    %118 = math.exp %117 : vector<1x64xf32>
    %cst_101 = arith.constant 1.000000e+00 : f32
    %119 = vector.broadcast %cst_101 : f32 to vector<1x64xf32>
    %120 = arith.addf %119, %118 : vector<1x64xf32>
    %121 = arith.divf %119, %120 : vector<1x64xf32>
    %122 = vector.extract_strided_slice %111 {offsets = [0, 64], sizes = [1, 64], strides = [1, 1]} : vector<1x192xf32> to vector<1x64xf32>
    %123 = vector.extract_strided_slice %113 {offsets = [0, 64], sizes = [1, 64], strides = [1, 1]} : vector<1x192xf32> to vector<1x64xf32>
    %124 = arith.addf %122, %123 : vector<1x64xf32>
    %125 = arith.negf %124 : vector<1x64xf32>
    %126 = math.exp %125 : vector<1x64xf32>
    %cst_102 = arith.constant 1.000000e+00 : f32
    %127 = vector.broadcast %cst_102 : f32 to vector<1x64xf32>
    %128 = arith.addf %127, %126 : vector<1x64xf32>
    %129 = arith.divf %127, %128 : vector<1x64xf32>
    %130 = vector.extract_strided_slice %111 {offsets = [0, 128], sizes = [1, 64], strides = [1, 1]} : vector<1x192xf32> to vector<1x64xf32>
    %131 = vector.extract_strided_slice %113 {offsets = [0, 128], sizes = [1, 64], strides = [1, 1]} : vector<1x192xf32> to vector<1x64xf32>
    %132 = arith.mulf %121, %131 : vector<1x64xf32>
    %133 = arith.addf %130, %132 : vector<1x64xf32>
    %134 = math.tanh %133 : vector<1x64xf32>
    %cst_103 = arith.constant 1.000000e+00 : f32
    %135 = vector.broadcast %cst_103 : f32 to vector<1x64xf32>
    %136 = arith.subf %135, %129 : vector<1x64xf32>
    %137 = arith.mulf %136, %134 : vector<1x64xf32>
    %138 = arith.mulf %129, %101 : vector<1x64xf32>
    %139 = arith.addf %137, %138 : vector<1x64xf32>
    %140 = vector.extract_strided_slice %139 {offsets = [0, 0], sizes = [1, 32], strides = [1, 1]} : vector<1x64xf32> to vector<1x32xf32>
    %141 = arith.index_cast %c0_i32 : i32 to index
    %c0_104 = arith.constant 0 : index
    %142 = vector.load %arg25[%141, %c0_104] : memref<8x32xf32, #tpu.memory_space<vmem>>, vector<1x32xf32>
    tpu.vector_store %arg25[%141, %c0_104], %140 {strides = array<i32>} : memref<8x32xf32, #tpu.memory_space<vmem>>, vector<1x32xf32>,
    %143 = vector.extract_strided_slice %139 {offsets = [0, 32], sizes = [1, 32], strides = [1, 1]} : vector<1x64xf32> to vector<1x32xf32>
    %144 = arith.index_cast %102 : i32 to index
    %c0_105 = arith.constant 0 : index
    %145 = vector.load %arg26[%144, %c0_105] : memref<8x32xf32, #tpu.memory_space<vmem>>, vector<1x32xf32>
    tpu.vector_store %arg26[%144, %c0_105], %143 {strides = array<i32>} : memref<8x32xf32, #tpu.memory_space<vmem>>, vector<1x32xf32>,
    %c1_i32 = arith.constant 1 : i32
    %c7_i32_106 = arith.constant 7 : i32
    %146 = arith.subi %c7_i32_106, %c1_i32 : i32
    %147 = arith.index_cast %c1_i32 : i32 to index
    %c0_107 = arith.constant 0 : index
    %148 = vector.load %arg24[%147, %c0_107] : memref<8x192xf32, #tpu.memory_space<vmem>>, vector<1x192xf32>
    %149 = arith.index_cast %146 : i32 to index
    %c0_108 = arith.constant 0 : index
    %150 = vector.load %arg24[%149, %c0_108] : memref<8x192xf32, #tpu.memory_space<vmem>>, vector<1x192xf32>
    %151 = arith.mulf %100, %148 : vector<1x192xf32>
    %cst_109 = arith.constant 1.000000e+00 : f32
    %152 = vector.broadcast %cst_109 : f32 to vector<1x192xf32>
    %153 = arith.subf %152, %100 : vector<1x192xf32>
    %154 = arith.mulf %153, %150 : vector<1x192xf32>
    %155 = arith.addf %151, %154 : vector<1x192xf32>
    %cst_110 = arith.constant dense<0.000000e+00> : vector<1x192xf32>
    %156 = tpu.matmul %139, %98, %cst_110 {dimension_numbers = #tpu.dot_dimension_numbers<[1], [0], [0], [1], [0, 0, 1, 1], [], []>} : vector<1x64xf32>, vector<64x192xf32>, vector<1x192xf32> -> vector<1x192xf32>
    %157 = arith.addf %156, %99 : vector<1x192xf32>
    %158 = vector.extract_strided_slice %155 {offsets = [0, 0], sizes = [1, 64], strides = [1, 1]} : vector<1x192xf32> to vector<1x64xf32>
    %159 = vector.extract_strided_slice %157 {offsets = [0, 0], sizes = [1, 64], strides = [1, 1]} : vector<1x192xf32> to vector<1x64xf32>
    %160 = arith.addf %158, %159 : vector<1x64xf32>
    %161 = arith.negf %160 : vector<1x64xf32>
    %162 = math.exp %161 : vector<1x64xf32>
    %cst_111 = arith.constant 1.000000e+00 : f32
    %163 = vector.broadcast %cst_111 : f32 to vector<1x64xf32>
    %164 = arith.addf %163, %162 : vector<1x64xf32>
    %165 = arith.divf %163, %164 : vector<1x64xf32>
    %166 = vector.extract_strided_slice %155 {offsets = [0, 64], sizes = [1, 64], strides = [1, 1]} : vector<1x192xf32> to vector<1x64xf32>
    %167 = vector.extract_strided_slice %157 {offsets = [0, 64], sizes = [1, 64], strides = [1, 1]} : vector<1x192xf32> to vector<1x64xf32>
    %168 = arith.addf %166, %167 : vector<1x64xf32>
    %169 = arith.negf %168 : vector<1x64xf32>
    %170 = math.exp %169 : vector<1x64xf32>
    %cst_112 = arith.constant 1.000000e+00 : f32
    %171 = vector.broadcast %cst_112 : f32 to vector<1x64xf32>
    %172 = arith.addf %171, %170 : vector<1x64xf32>
    %173 = arith.divf %171, %172 : vector<1x64xf32>
    %174 = vector.extract_strided_slice %155 {offsets = [0, 128], sizes = [1, 64], strides = [1, 1]} : vector<1x192xf32> to vector<1x64xf32>
    %175 = vector.extract_strided_slice %157 {offsets = [0, 128], sizes = [1, 64], strides = [1, 1]} : vector<1x192xf32> to vector<1x64xf32>
    %176 = arith.mulf %165, %175 : vector<1x64xf32>
    %177 = arith.addf %174, %176 : vector<1x64xf32>
    %178 = math.tanh %177 : vector<1x64xf32>
    %cst_113 = arith.constant 1.000000e+00 : f32
    %179 = vector.broadcast %cst_113 : f32 to vector<1x64xf32>
    %180 = arith.subf %179, %173 : vector<1x64xf32>
    %181 = arith.mulf %180, %178 : vector<1x64xf32>
    %182 = arith.mulf %173, %139 : vector<1x64xf32>
    %183 = arith.addf %181, %182 : vector<1x64xf32>
    %184 = vector.extract_strided_slice %183 {offsets = [0, 0], sizes = [1, 32], strides = [1, 1]} : vector<1x64xf32> to vector<1x32xf32>
    %185 = arith.index_cast %c1_i32 : i32 to index
    %c0_114 = arith.constant 0 : index
    %186 = vector.load %arg25[%185, %c0_114] : memref<8x32xf32, #tpu.memory_space<vmem>>, vector<1x32xf32>
    tpu.vector_store %arg25[%185, %c0_114], %184 {strides = array<i32>} : memref<8x32xf32, #tpu.memory_space<vmem>>, vector<1x32xf32>,
    %187 = vector.extract_strided_slice %183 {offsets = [0, 32], sizes = [1, 32], strides = [1, 1]} : vector<1x64xf32> to vector<1x32xf32>
    %188 = arith.index_cast %146 : i32 to index
    %c0_115 = arith.constant 0 : index
    %189 = vector.load %arg26[%188, %c0_115] : memref<8x32xf32, #tpu.memory_space<vmem>>, vector<1x32xf32>
    tpu.vector_store %arg26[%188, %c0_115], %187 {strides = array<i32>} : memref<8x32xf32, #tpu.memory_space<vmem>>, vector<1x32xf32>,
    %c2_i32 = arith.constant 2 : i32
    %c7_i32_116 = arith.constant 7 : i32
    %190 = arith.subi %c7_i32_116, %c2_i32 : i32
    %191 = arith.index_cast %c2_i32 : i32 to index
    %c0_117 = arith.constant 0 : index
    %192 = vector.load %arg24[%191, %c0_117] : memref<8x192xf32, #tpu.memory_space<vmem>>, vector<1x192xf32>
    %193 = arith.index_cast %190 : i32 to index
    %c0_118 = arith.constant 0 : index
    %194 = vector.load %arg24[%193, %c0_118] : memref<8x192xf32, #tpu.memory_space<vmem>>, vector<1x192xf32>
    %195 = arith.mulf %100, %192 : vector<1x192xf32>
    %cst_119 = arith.constant 1.000000e+00 : f32
    %196 = vector.broadcast %cst_119 : f32 to vector<1x192xf32>
    %197 = arith.subf %196, %100 : vector<1x192xf32>
    %198 = arith.mulf %197, %194 : vector<1x192xf32>
    %199 = arith.addf %195, %198 : vector<1x192xf32>
    %cst_120 = arith.constant dense<0.000000e+00> : vector<1x192xf32>
    %200 = tpu.matmul %183, %98, %cst_120 {dimension_numbers = #tpu.dot_dimension_numbers<[1], [0], [0], [1], [0, 0, 1, 1], [], []>} : vector<1x64xf32>, vector<64x192xf32>, vector<1x192xf32> -> vector<1x192xf32>
    %201 = arith.addf %200, %99 : vector<1x192xf32>
    %202 = vector.extract_strided_slice %199 {offsets = [0, 0], sizes = [1, 64], strides = [1, 1]} : vector<1x192xf32> to vector<1x64xf32>
    %203 = vector.extract_strided_slice %201 {offsets = [0, 0], sizes = [1, 64], strides = [1, 1]} : vector<1x192xf32> to vector<1x64xf32>
    %204 = arith.addf %202, %203 : vector<1x64xf32>
    %205 = arith.negf %204 : vector<1x64xf32>
    %206 = math.exp %205 : vector<1x64xf32>
    %cst_121 = arith.constant 1.000000e+00 : f32
    %207 = vector.broadcast %cst_121 : f32 to vector<1x64xf32>
    %208 = arith.addf %207, %206 : vector<1x64xf32>
    %209 = arith.divf %207, %208 : vector<1x64xf32>
    %210 = vector.extract_strided_slice %199 {offsets = [0, 64], sizes = [1, 64], strides = [1, 1]} : vector<1x192xf32> to vector<1x64xf32>
    %211 = vector.extract_strided_slice %201 {offsets = [0, 64], sizes = [1, 64], strides = [1, 1]} : vector<1x192xf32> to vector<1x64xf32>
    %212 = arith.addf %210, %211 : vector<1x64xf32>
    %213 = arith.negf %212 : vector<1x64xf32>
    %214 = math.exp %213 : vector<1x64xf32>
    %cst_122 = arith.constant 1.000000e+00 : f32
    %215 = vector.broadcast %cst_122 : f32 to vector<1x64xf32>
    %216 = arith.addf %215, %214 : vector<1x64xf32>
    %217 = arith.divf %215, %216 : vector<1x64xf32>
    %218 = vector.extract_strided_slice %199 {offsets = [0, 128], sizes = [1, 64], strides = [1, 1]} : vector<1x192xf32> to vector<1x64xf32>
    %219 = vector.extract_strided_slice %201 {offsets = [0, 128], sizes = [1, 64], strides = [1, 1]} : vector<1x192xf32> to vector<1x64xf32>
    %220 = arith.mulf %209, %219 : vector<1x64xf32>
    %221 = arith.addf %218, %220 : vector<1x64xf32>
    %222 = math.tanh %221 : vector<1x64xf32>
    %cst_123 = arith.constant 1.000000e+00 : f32
    %223 = vector.broadcast %cst_123 : f32 to vector<1x64xf32>
    %224 = arith.subf %223, %217 : vector<1x64xf32>
    %225 = arith.mulf %224, %222 : vector<1x64xf32>
    %226 = arith.mulf %217, %183 : vector<1x64xf32>
    %227 = arith.addf %225, %226 : vector<1x64xf32>
    %228 = vector.extract_strided_slice %227 {offsets = [0, 0], sizes = [1, 32], strides = [1, 1]} : vector<1x64xf32> to vector<1x32xf32>
    %229 = arith.index_cast %c2_i32 : i32 to index
    %c0_124 = arith.constant 0 : index
    %230 = vector.load %arg25[%229, %c0_124] : memref<8x32xf32, #tpu.memory_space<vmem>>, vector<1x32xf32>
    tpu.vector_store %arg25[%229, %c0_124], %228 {strides = array<i32>} : memref<8x32xf32, #tpu.memory_space<vmem>>, vector<1x32xf32>,
    %231 = vector.extract_strided_slice %227 {offsets = [0, 32], sizes = [1, 32], strides = [1, 1]} : vector<1x64xf32> to vector<1x32xf32>
    %232 = arith.index_cast %190 : i32 to index
    %c0_125 = arith.constant 0 : index
    %233 = vector.load %arg26[%232, %c0_125] : memref<8x32xf32, #tpu.memory_space<vmem>>, vector<1x32xf32>
    tpu.vector_store %arg26[%232, %c0_125], %231 {strides = array<i32>} : memref<8x32xf32, #tpu.memory_space<vmem>>, vector<1x32xf32>,
    %c3_i32 = arith.constant 3 : i32
    %c7_i32_126 = arith.constant 7 : i32
    %234 = arith.subi %c7_i32_126, %c3_i32 : i32
    %235 = arith.index_cast %c3_i32 : i32 to index
    %c0_127 = arith.constant 0 : index
    %236 = vector.load %arg24[%235, %c0_127] : memref<8x192xf32, #tpu.memory_space<vmem>>, vector<1x192xf32>
    %237 = arith.index_cast %234 : i32 to index
    %c0_128 = arith.constant 0 : index
    %238 = vector.load %arg24[%237, %c0_128] : memref<8x192xf32, #tpu.memory_space<vmem>>, vector<1x192xf32>
    %239 = arith.mulf %100, %236 : vector<1x192xf32>
    %cst_129 = arith.constant 1.000000e+00 : f32
    %240 = vector.broadcast %cst_129 : f32 to vector<1x192xf32>
    %241 = arith.subf %240, %100 : vector<1x192xf32>
    %242 = arith.mulf %241, %238 : vector<1x192xf32>
    %243 = arith.addf %239, %242 : vector<1x192xf32>
    %cst_130 = arith.constant dense<0.000000e+00> : vector<1x192xf32>
    %244 = tpu.matmul %227, %98, %cst_130 {dimension_numbers = #tpu.dot_dimension_numbers<[1], [0], [0], [1], [0, 0, 1, 1], [], []>} : vector<1x64xf32>, vector<64x192xf32>, vector<1x192xf32> -> vector<1x192xf32>
    %245 = arith.addf %244, %99 : vector<1x192xf32>
    %246 = vector.extract_strided_slice %243 {offsets = [0, 0], sizes = [1, 64], strides = [1, 1]} : vector<1x192xf32> to vector<1x64xf32>
    %247 = vector.extract_strided_slice %245 {offsets = [0, 0], sizes = [1, 64], strides = [1, 1]} : vector<1x192xf32> to vector<1x64xf32>
    %248 = arith.addf %246, %247 : vector<1x64xf32>
    %249 = arith.negf %248 : vector<1x64xf32>
    %250 = math.exp %249 : vector<1x64xf32>
    %cst_131 = arith.constant 1.000000e+00 : f32
    %251 = vector.broadcast %cst_131 : f32 to vector<1x64xf32>
    %252 = arith.addf %251, %250 : vector<1x64xf32>
    %253 = arith.divf %251, %252 : vector<1x64xf32>
    %254 = vector.extract_strided_slice %243 {offsets = [0, 64], sizes = [1, 64], strides = [1, 1]} : vector<1x192xf32> to vector<1x64xf32>
    %255 = vector.extract_strided_slice %245 {offsets = [0, 64], sizes = [1, 64], strides = [1, 1]} : vector<1x192xf32> to vector<1x64xf32>
    %256 = arith.addf %254, %255 : vector<1x64xf32>
    %257 = arith.negf %256 : vector<1x64xf32>
    %258 = math.exp %257 : vector<1x64xf32>
    %cst_132 = arith.constant 1.000000e+00 : f32
    %259 = vector.broadcast %cst_132 : f32 to vector<1x64xf32>
    %260 = arith.addf %259, %258 : vector<1x64xf32>
    %261 = arith.divf %259, %260 : vector<1x64xf32>
    %262 = vector.extract_strided_slice %243 {offsets = [0, 128], sizes = [1, 64], strides = [1, 1]} : vector<1x192xf32> to vector<1x64xf32>
    %263 = vector.extract_strided_slice %245 {offsets = [0, 128], sizes = [1, 64], strides = [1, 1]} : vector<1x192xf32> to vector<1x64xf32>
    %264 = arith.mulf %253, %263 : vector<1x64xf32>
    %265 = arith.addf %262, %264 : vector<1x64xf32>
    %266 = math.tanh %265 : vector<1x64xf32>
    %cst_133 = arith.constant 1.000000e+00 : f32
    %267 = vector.broadcast %cst_133 : f32 to vector<1x64xf32>
    %268 = arith.subf %267, %261 : vector<1x64xf32>
    %269 = arith.mulf %268, %266 : vector<1x64xf32>
    %270 = arith.mulf %261, %227 : vector<1x64xf32>
    %271 = arith.addf %269, %270 : vector<1x64xf32>
    %272 = vector.extract_strided_slice %271 {offsets = [0, 0], sizes = [1, 32], strides = [1, 1]} : vector<1x64xf32> to vector<1x32xf32>
    %273 = arith.index_cast %c3_i32 : i32 to index
    %c0_134 = arith.constant 0 : index
    %274 = vector.load %arg25[%273, %c0_134] : memref<8x32xf32, #tpu.memory_space<vmem>>, vector<1x32xf32>
    tpu.vector_store %arg25[%273, %c0_134], %272 {strides = array<i32>} : memref<8x32xf32, #tpu.memory_space<vmem>>, vector<1x32xf32>,
    %275 = vector.extract_strided_slice %271 {offsets = [0, 32], sizes = [1, 32], strides = [1, 1]} : vector<1x64xf32> to vector<1x32xf32>
    %276 = arith.index_cast %234 : i32 to index
    %c0_135 = arith.constant 0 : index
    %277 = vector.load %arg26[%276, %c0_135] : memref<8x32xf32, #tpu.memory_space<vmem>>, vector<1x32xf32>
    tpu.vector_store %arg26[%276, %c0_135], %275 {strides = array<i32>} : memref<8x32xf32, #tpu.memory_space<vmem>>, vector<1x32xf32>,
    %c4_i32 = arith.constant 4 : i32
    %c7_i32_136 = arith.constant 7 : i32
    %278 = arith.subi %c7_i32_136, %c4_i32 : i32
    %279 = arith.index_cast %c4_i32 : i32 to index
    %c0_137 = arith.constant 0 : index
    %280 = vector.load %arg24[%279, %c0_137] : memref<8x192xf32, #tpu.memory_space<vmem>>, vector<1x192xf32>
    %281 = arith.index_cast %278 : i32 to index
    %c0_138 = arith.constant 0 : index
    %282 = vector.load %arg24[%281, %c0_138] : memref<8x192xf32, #tpu.memory_space<vmem>>, vector<1x192xf32>
    %283 = arith.mulf %100, %280 : vector<1x192xf32>
    %cst_139 = arith.constant 1.000000e+00 : f32
    %284 = vector.broadcast %cst_139 : f32 to vector<1x192xf32>
    %285 = arith.subf %284, %100 : vector<1x192xf32>
    %286 = arith.mulf %285, %282 : vector<1x192xf32>
    %287 = arith.addf %283, %286 : vector<1x192xf32>
    %cst_140 = arith.constant dense<0.000000e+00> : vector<1x192xf32>
    %288 = tpu.matmul %271, %98, %cst_140 {dimension_numbers = #tpu.dot_dimension_numbers<[1], [0], [0], [1], [0, 0, 1, 1], [], []>} : vector<1x64xf32>, vector<64x192xf32>, vector<1x192xf32> -> vector<1x192xf32>
    %289 = arith.addf %288, %99 : vector<1x192xf32>
    %290 = vector.extract_strided_slice %287 {offsets = [0, 0], sizes = [1, 64], strides = [1, 1]} : vector<1x192xf32> to vector<1x64xf32>
    %291 = vector.extract_strided_slice %289 {offsets = [0, 0], sizes = [1, 64], strides = [1, 1]} : vector<1x192xf32> to vector<1x64xf32>
    %292 = arith.addf %290, %291 : vector<1x64xf32>
    %293 = arith.negf %292 : vector<1x64xf32>
    %294 = math.exp %293 : vector<1x64xf32>
    %cst_141 = arith.constant 1.000000e+00 : f32
    %295 = vector.broadcast %cst_141 : f32 to vector<1x64xf32>
    %296 = arith.addf %295, %294 : vector<1x64xf32>
    %297 = arith.divf %295, %296 : vector<1x64xf32>
    %298 = vector.extract_strided_slice %287 {offsets = [0, 64], sizes = [1, 64], strides = [1, 1]} : vector<1x192xf32> to vector<1x64xf32>
    %299 = vector.extract_strided_slice %289 {offsets = [0, 64], sizes = [1, 64], strides = [1, 1]} : vector<1x192xf32> to vector<1x64xf32>
    %300 = arith.addf %298, %299 : vector<1x64xf32>
    %301 = arith.negf %300 : vector<1x64xf32>
    %302 = math.exp %301 : vector<1x64xf32>
    %cst_142 = arith.constant 1.000000e+00 : f32
    %303 = vector.broadcast %cst_142 : f32 to vector<1x64xf32>
    %304 = arith.addf %303, %302 : vector<1x64xf32>
    %305 = arith.divf %303, %304 : vector<1x64xf32>
    %306 = vector.extract_strided_slice %287 {offsets = [0, 128], sizes = [1, 64], strides = [1, 1]} : vector<1x192xf32> to vector<1x64xf32>
    %307 = vector.extract_strided_slice %289 {offsets = [0, 128], sizes = [1, 64], strides = [1, 1]} : vector<1x192xf32> to vector<1x64xf32>
    %308 = arith.mulf %297, %307 : vector<1x64xf32>
    %309 = arith.addf %306, %308 : vector<1x64xf32>
    %310 = math.tanh %309 : vector<1x64xf32>
    %cst_143 = arith.constant 1.000000e+00 : f32
    %311 = vector.broadcast %cst_143 : f32 to vector<1x64xf32>
    %312 = arith.subf %311, %305 : vector<1x64xf32>
    %313 = arith.mulf %312, %310 : vector<1x64xf32>
    %314 = arith.mulf %305, %271 : vector<1x64xf32>
    %315 = arith.addf %313, %314 : vector<1x64xf32>
    %316 = vector.extract_strided_slice %315 {offsets = [0, 0], sizes = [1, 32], strides = [1, 1]} : vector<1x64xf32> to vector<1x32xf32>
    %317 = arith.index_cast %c4_i32 : i32 to index
    %c0_144 = arith.constant 0 : index
    %318 = vector.load %arg25[%317, %c0_144] : memref<8x32xf32, #tpu.memory_space<vmem>>, vector<1x32xf32>
    tpu.vector_store %arg25[%317, %c0_144], %316 {strides = array<i32>} : memref<8x32xf32, #tpu.memory_space<vmem>>, vector<1x32xf32>,
    %319 = vector.extract_strided_slice %315 {offsets = [0, 32], sizes = [1, 32], strides = [1, 1]} : vector<1x64xf32> to vector<1x32xf32>
    %320 = arith.index_cast %278 : i32 to index
    %c0_145 = arith.constant 0 : index
    %321 = vector.load %arg26[%320, %c0_145] : memref<8x32xf32, #tpu.memory_space<vmem>>, vector<1x32xf32>
    tpu.vector_store %arg26[%320, %c0_145], %319 {strides = array<i32>} : memref<8x32xf32, #tpu.memory_space<vmem>>, vector<1x32xf32>,
    %c5_i32 = arith.constant 5 : i32
    %c7_i32_146 = arith.constant 7 : i32
    %322 = arith.subi %c7_i32_146, %c5_i32 : i32
    %323 = arith.index_cast %c5_i32 : i32 to index
    %c0_147 = arith.constant 0 : index
    %324 = vector.load %arg24[%323, %c0_147] : memref<8x192xf32, #tpu.memory_space<vmem>>, vector<1x192xf32>
    %325 = arith.index_cast %322 : i32 to index
    %c0_148 = arith.constant 0 : index
    %326 = vector.load %arg24[%325, %c0_148] : memref<8x192xf32, #tpu.memory_space<vmem>>, vector<1x192xf32>
    %327 = arith.mulf %100, %324 : vector<1x192xf32>
    %cst_149 = arith.constant 1.000000e+00 : f32
    %328 = vector.broadcast %cst_149 : f32 to vector<1x192xf32>
    %329 = arith.subf %328, %100 : vector<1x192xf32>
    %330 = arith.mulf %329, %326 : vector<1x192xf32>
    %331 = arith.addf %327, %330 : vector<1x192xf32>
    %cst_150 = arith.constant dense<0.000000e+00> : vector<1x192xf32>
    %332 = tpu.matmul %315, %98, %cst_150 {dimension_numbers = #tpu.dot_dimension_numbers<[1], [0], [0], [1], [0, 0, 1, 1], [], []>} : vector<1x64xf32>, vector<64x192xf32>, vector<1x192xf32> -> vector<1x192xf32>
    %333 = arith.addf %332, %99 : vector<1x192xf32>
    %334 = vector.extract_strided_slice %331 {offsets = [0, 0], sizes = [1, 64], strides = [1, 1]} : vector<1x192xf32> to vector<1x64xf32>
    %335 = vector.extract_strided_slice %333 {offsets = [0, 0], sizes = [1, 64], strides = [1, 1]} : vector<1x192xf32> to vector<1x64xf32>
    %336 = arith.addf %334, %335 : vector<1x64xf32>
    %337 = arith.negf %336 : vector<1x64xf32>
    %338 = math.exp %337 : vector<1x64xf32>
    %cst_151 = arith.constant 1.000000e+00 : f32
    %339 = vector.broadcast %cst_151 : f32 to vector<1x64xf32>
    %340 = arith.addf %339, %338 : vector<1x64xf32>
    %341 = arith.divf %339, %340 : vector<1x64xf32>
    %342 = vector.extract_strided_slice %331 {offsets = [0, 64], sizes = [1, 64], strides = [1, 1]} : vector<1x192xf32> to vector<1x64xf32>
    %343 = vector.extract_strided_slice %333 {offsets = [0, 64], sizes = [1, 64], strides = [1, 1]} : vector<1x192xf32> to vector<1x64xf32>
    %344 = arith.addf %342, %343 : vector<1x64xf32>
    %345 = arith.negf %344 : vector<1x64xf32>
    %346 = math.exp %345 : vector<1x64xf32>
    %cst_152 = arith.constant 1.000000e+00 : f32
    %347 = vector.broadcast %cst_152 : f32 to vector<1x64xf32>
    %348 = arith.addf %347, %346 : vector<1x64xf32>
    %349 = arith.divf %347, %348 : vector<1x64xf32>
    %350 = vector.extract_strided_slice %331 {offsets = [0, 128], sizes = [1, 64], strides = [1, 1]} : vector<1x192xf32> to vector<1x64xf32>
    %351 = vector.extract_strided_slice %333 {offsets = [0, 128], sizes = [1, 64], strides = [1, 1]} : vector<1x192xf32> to vector<1x64xf32>
    %352 = arith.mulf %341, %351 : vector<1x64xf32>
    %353 = arith.addf %350, %352 : vector<1x64xf32>
    %354 = math.tanh %353 : vector<1x64xf32>
    %cst_153 = arith.constant 1.000000e+00 : f32
    %355 = vector.broadcast %cst_153 : f32 to vector<1x64xf32>
    %356 = arith.subf %355, %349 : vector<1x64xf32>
    %357 = arith.mulf %356, %354 : vector<1x64xf32>
    %358 = arith.mulf %349, %315 : vector<1x64xf32>
    %359 = arith.addf %357, %358 : vector<1x64xf32>
    %360 = vector.extract_strided_slice %359 {offsets = [0, 0], sizes = [1, 32], strides = [1, 1]} : vector<1x64xf32> to vector<1x32xf32>
    %361 = arith.index_cast %c5_i32 : i32 to index
    %c0_154 = arith.constant 0 : index
    %362 = vector.load %arg25[%361, %c0_154] : memref<8x32xf32, #tpu.memory_space<vmem>>, vector<1x32xf32>
    tpu.vector_store %arg25[%361, %c0_154], %360 {strides = array<i32>} : memref<8x32xf32, #tpu.memory_space<vmem>>, vector<1x32xf32>,
    %363 = vector.extract_strided_slice %359 {offsets = [0, 32], sizes = [1, 32], strides = [1, 1]} : vector<1x64xf32> to vector<1x32xf32>
    %364 = arith.index_cast %322 : i32 to index
    %c0_155 = arith.constant 0 : index
    %365 = vector.load %arg26[%364, %c0_155] : memref<8x32xf32, #tpu.memory_space<vmem>>, vector<1x32xf32>
    tpu.vector_store %arg26[%364, %c0_155], %363 {strides = array<i32>} : memref<8x32xf32, #tpu.memory_space<vmem>>, vector<1x32xf32>,
    %c6_i32 = arith.constant 6 : i32
    %c7_i32_156 = arith.constant 7 : i32
    %366 = arith.subi %c7_i32_156, %c6_i32 : i32
    %367 = arith.index_cast %c6_i32 : i32 to index
    %c0_157 = arith.constant 0 : index
    %368 = vector.load %arg24[%367, %c0_157] : memref<8x192xf32, #tpu.memory_space<vmem>>, vector<1x192xf32>
    %369 = arith.index_cast %366 : i32 to index
    %c0_158 = arith.constant 0 : index
    %370 = vector.load %arg24[%369, %c0_158] : memref<8x192xf32, #tpu.memory_space<vmem>>, vector<1x192xf32>
    %371 = arith.mulf %100, %368 : vector<1x192xf32>
    %cst_159 = arith.constant 1.000000e+00 : f32
    %372 = vector.broadcast %cst_159 : f32 to vector<1x192xf32>
    %373 = arith.subf %372, %100 : vector<1x192xf32>
    %374 = arith.mulf %373, %370 : vector<1x192xf32>
    %375 = arith.addf %371, %374 : vector<1x192xf32>
    %cst_160 = arith.constant dense<0.000000e+00> : vector<1x192xf32>
    %376 = tpu.matmul %359, %98, %cst_160 {dimension_numbers = #tpu.dot_dimension_numbers<[1], [0], [0], [1], [0, 0, 1, 1], [], []>} : vector<1x64xf32>, vector<64x192xf32>, vector<1x192xf32> -> vector<1x192xf32>
    %377 = arith.addf %376, %99 : vector<1x192xf32>
    %378 = vector.extract_strided_slice %375 {offsets = [0, 0], sizes = [1, 64], strides = [1, 1]} : vector<1x192xf32> to vector<1x64xf32>
    %379 = vector.extract_strided_slice %377 {offsets = [0, 0], sizes = [1, 64], strides = [1, 1]} : vector<1x192xf32> to vector<1x64xf32>
    %380 = arith.addf %378, %379 : vector<1x64xf32>
    %381 = arith.negf %380 : vector<1x64xf32>
    %382 = math.exp %381 : vector<1x64xf32>
    %cst_161 = arith.constant 1.000000e+00 : f32
    %383 = vector.broadcast %cst_161 : f32 to vector<1x64xf32>
    %384 = arith.addf %383, %382 : vector<1x64xf32>
    %385 = arith.divf %383, %384 : vector<1x64xf32>
    %386 = vector.extract_strided_slice %375 {offsets = [0, 64], sizes = [1, 64], strides = [1, 1]} : vector<1x192xf32> to vector<1x64xf32>
    %387 = vector.extract_strided_slice %377 {offsets = [0, 64], sizes = [1, 64], strides = [1, 1]} : vector<1x192xf32> to vector<1x64xf32>
    %388 = arith.addf %386, %387 : vector<1x64xf32>
    %389 = arith.negf %388 : vector<1x64xf32>
    %390 = math.exp %389 : vector<1x64xf32>
    %cst_162 = arith.constant 1.000000e+00 : f32
    %391 = vector.broadcast %cst_162 : f32 to vector<1x64xf32>
    %392 = arith.addf %391, %390 : vector<1x64xf32>
    %393 = arith.divf %391, %392 : vector<1x64xf32>
    %394 = vector.extract_strided_slice %375 {offsets = [0, 128], sizes = [1, 64], strides = [1, 1]} : vector<1x192xf32> to vector<1x64xf32>
    %395 = vector.extract_strided_slice %377 {offsets = [0, 128], sizes = [1, 64], strides = [1, 1]} : vector<1x192xf32> to vector<1x64xf32>
    %396 = arith.mulf %385, %395 : vector<1x64xf32>
    %397 = arith.addf %394, %396 : vector<1x64xf32>
    %398 = math.tanh %397 : vector<1x64xf32>
    %cst_163 = arith.constant 1.000000e+00 : f32
    %399 = vector.broadcast %cst_163 : f32 to vector<1x64xf32>
    %400 = arith.subf %399, %393 : vector<1x64xf32>
    %401 = arith.mulf %400, %398 : vector<1x64xf32>
    %402 = arith.mulf %393, %359 : vector<1x64xf32>
    %403 = arith.addf %401, %402 : vector<1x64xf32>
    %404 = vector.extract_strided_slice %403 {offsets = [0, 0], sizes = [1, 32], strides = [1, 1]} : vector<1x64xf32> to vector<1x32xf32>
    %405 = arith.index_cast %c6_i32 : i32 to index
    %c0_164 = arith.constant 0 : index
    %406 = vector.load %arg25[%405, %c0_164] : memref<8x32xf32, #tpu.memory_space<vmem>>, vector<1x32xf32>
    tpu.vector_store %arg25[%405, %c0_164], %404 {strides = array<i32>} : memref<8x32xf32, #tpu.memory_space<vmem>>, vector<1x32xf32>,
    %407 = vector.extract_strided_slice %403 {offsets = [0, 32], sizes = [1, 32], strides = [1, 1]} : vector<1x64xf32> to vector<1x32xf32>
    %408 = arith.index_cast %366 : i32 to index
    %c0_165 = arith.constant 0 : index
    %409 = vector.load %arg26[%408, %c0_165] : memref<8x32xf32, #tpu.memory_space<vmem>>, vector<1x32xf32>
    tpu.vector_store %arg26[%408, %c0_165], %407 {strides = array<i32>} : memref<8x32xf32, #tpu.memory_space<vmem>>, vector<1x32xf32>,
    %c7_i32_166 = arith.constant 7 : i32
    %c7_i32_167 = arith.constant 7 : i32
    %410 = arith.subi %c7_i32_167, %c7_i32_166 : i32
    %411 = arith.index_cast %c7_i32_166 : i32 to index
    %c0_168 = arith.constant 0 : index
    %412 = vector.load %arg24[%411, %c0_168] : memref<8x192xf32, #tpu.memory_space<vmem>>, vector<1x192xf32>
    %413 = arith.index_cast %410 : i32 to index
    %c0_169 = arith.constant 0 : index
    %414 = vector.load %arg24[%413, %c0_169] : memref<8x192xf32, #tpu.memory_space<vmem>>, vector<1x192xf32>
    %415 = arith.mulf %100, %412 : vector<1x192xf32>
    %cst_170 = arith.constant 1.000000e+00 : f32
    %416 = vector.broadcast %cst_170 : f32 to vector<1x192xf32>
    %417 = arith.subf %416, %100 : vector<1x192xf32>
    %418 = arith.mulf %417, %414 : vector<1x192xf32>
    %419 = arith.addf %415, %418 : vector<1x192xf32>
    %cst_171 = arith.constant dense<0.000000e+00> : vector<1x192xf32>
    %420 = tpu.matmul %403, %98, %cst_171 {dimension_numbers = #tpu.dot_dimension_numbers<[1], [0], [0], [1], [0, 0, 1, 1], [], []>} : vector<1x64xf32>, vector<64x192xf32>, vector<1x192xf32> -> vector<1x192xf32>
    %421 = arith.addf %420, %99 : vector<1x192xf32>
    %422 = vector.extract_strided_slice %419 {offsets = [0, 0], sizes = [1, 64], strides = [1, 1]} : vector<1x192xf32> to vector<1x64xf32>
    %423 = vector.extract_strided_slice %421 {offsets = [0, 0], sizes = [1, 64], strides = [1, 1]} : vector<1x192xf32> to vector<1x64xf32>
    %424 = arith.addf %422, %423 : vector<1x64xf32>
    %425 = arith.negf %424 : vector<1x64xf32>
    %426 = math.exp %425 : vector<1x64xf32>
    %cst_172 = arith.constant 1.000000e+00 : f32
    %427 = vector.broadcast %cst_172 : f32 to vector<1x64xf32>
    %428 = arith.addf %427, %426 : vector<1x64xf32>
    %429 = arith.divf %427, %428 : vector<1x64xf32>
    %430 = vector.extract_strided_slice %419 {offsets = [0, 64], sizes = [1, 64], strides = [1, 1]} : vector<1x192xf32> to vector<1x64xf32>
    %431 = vector.extract_strided_slice %421 {offsets = [0, 64], sizes = [1, 64], strides = [1, 1]} : vector<1x192xf32> to vector<1x64xf32>
    %432 = arith.addf %430, %431 : vector<1x64xf32>
    %433 = arith.negf %432 : vector<1x64xf32>
    %434 = math.exp %433 : vector<1x64xf32>
    %cst_173 = arith.constant 1.000000e+00 : f32
    %435 = vector.broadcast %cst_173 : f32 to vector<1x64xf32>
    %436 = arith.addf %435, %434 : vector<1x64xf32>
    %437 = arith.divf %435, %436 : vector<1x64xf32>
    %438 = vector.extract_strided_slice %419 {offsets = [0, 128], sizes = [1, 64], strides = [1, 1]} : vector<1x192xf32> to vector<1x64xf32>
    %439 = vector.extract_strided_slice %421 {offsets = [0, 128], sizes = [1, 64], strides = [1, 1]} : vector<1x192xf32> to vector<1x64xf32>
    %440 = arith.mulf %429, %439 : vector<1x64xf32>
    %441 = arith.addf %438, %440 : vector<1x64xf32>
    %442 = math.tanh %441 : vector<1x64xf32>
    %cst_174 = arith.constant 1.000000e+00 : f32
    %443 = vector.broadcast %cst_174 : f32 to vector<1x64xf32>
    %444 = arith.subf %443, %437 : vector<1x64xf32>
    %445 = arith.mulf %444, %442 : vector<1x64xf32>
    %446 = arith.mulf %437, %403 : vector<1x64xf32>
    %447 = arith.addf %445, %446 : vector<1x64xf32>
    %448 = vector.extract_strided_slice %447 {offsets = [0, 0], sizes = [1, 32], strides = [1, 1]} : vector<1x64xf32> to vector<1x32xf32>
    %449 = arith.index_cast %c7_i32_166 : i32 to index
    %c0_175 = arith.constant 0 : index
    %450 = vector.load %arg25[%449, %c0_175] : memref<8x32xf32, #tpu.memory_space<vmem>>, vector<1x32xf32>
    tpu.vector_store %arg25[%449, %c0_175], %448 {strides = array<i32>} : memref<8x32xf32, #tpu.memory_space<vmem>>, vector<1x32xf32>,
    %451 = vector.extract_strided_slice %447 {offsets = [0, 32], sizes = [1, 32], strides = [1, 1]} : vector<1x64xf32> to vector<1x32xf32>
    %452 = arith.index_cast %410 : i32 to index
    %c0_176 = arith.constant 0 : index
    %453 = vector.load %arg26[%452, %c0_176] : memref<8x32xf32, #tpu.memory_space<vmem>>, vector<1x32xf32>
    tpu.vector_store %arg26[%452, %c0_176], %451 {strides = array<i32>} : memref<8x32xf32, #tpu.memory_space<vmem>>, vector<1x32xf32>,
    %c8_i32 = arith.constant 8 : i32
    %c0_177 = arith.constant 0 : index
    %c0_178 = arith.constant 0 : index
    %454 = vector.load %arg25[%c0_177, %c0_178] : memref<8x32xf32, #tpu.memory_space<vmem>>, vector<8x32xf32>
    %c0_179 = arith.constant 0 : index
    %c0_180 = arith.constant 0 : index
    %455 = vector.load %arg26[%c0_179, %c0_180] : memref<8x32xf32, #tpu.memory_space<vmem>>, vector<8x32xf32>
    %456 = tpu.concatenate %454, %455 in 1 : vector<8x32xf32>, vector<8x32xf32> -> vector<8x64xf32>
    %c0_181 = arith.constant 0 : index
    %c0_182 = arith.constant 0 : index
    %457 = vector.load %arg16[%c0_181, %c0_182] : memref<64x32xf32, #tpu.memory_space<vmem>>, vector<64x32xf32>
    %cst_183 = arith.constant dense<0.000000e+00> : vector<8x32xf32>
    %458 = tpu.matmul %456, %457, %cst_183 {dimension_numbers = #tpu.dot_dimension_numbers<[1], [0], [0], [1], [0, 0, 1, 1], [], []>} : vector<8x64xf32>, vector<64x32xf32>, vector<8x32xf32> -> vector<8x32xf32>
    %c0_184 = arith.constant 0 : index
    %c0_185 = arith.constant 0 : index
    %459 = vector.load %arg17[%c0_184, %c0_185] : memref<1x32xf32, #tpu.memory_space<vmem>>, vector<1x32xf32>
    %460 = vector.broadcast %459 : vector<1x32xf32> to vector<8x32xf32>
    %461 = arith.addf %458, %460 : vector<8x32xf32>
    %c0_186 = arith.constant 0 : index
    %c0_187 = arith.constant 0 : index
    %462 = vector.load %arg18[%c0_186, %c0_187] : memref<32x5xf32, #tpu.memory_space<vmem>>, vector<32x5xf32>
    %cst_188 = arith.constant dense<0.000000e+00> : vector<8x5xf32>
    %463 = tpu.matmul %461, %462, %cst_188 {dimension_numbers = #tpu.dot_dimension_numbers<[1], [0], [0], [1], [0, 0, 1, 1], [], []>} : vector<8x32xf32>, vector<32x5xf32>, vector<8x5xf32> -> vector<8x5xf32>
    %c0_189 = arith.constant 0 : index
    %c0_190 = arith.constant 0 : index
    %464 = vector.load %arg19[%c0_189, %c0_190] : memref<1x5xf32, #tpu.memory_space<vmem>>, vector<1x5xf32>
    %465 = vector.broadcast %464 : vector<1x5xf32> to vector<8x5xf32>
    %466 = arith.addf %463, %465 : vector<8x5xf32>
    %c0_191 = arith.constant 0 : index
    %c0_192 = arith.constant 0 : index
    %c0_193 = arith.constant 0 : index
    %467 = vector.load %arg20[%c0_191, %c0_192, %c0_193] : memref<1x8x5xf32, #tpu.memory_space<vmem>>, vector<1x8x5xf32>
    %468 = vector.shape_cast %467 : vector<1x8x5xf32> to vector<8x5xf32>
    %469 = vector.shape_cast %466 : vector<8x5xf32> to vector<1x8x5xf32>
    tpu.vector_store %arg20[%c0_191, %c0_192, %c0_193], %469 {strides = array<i32>} : memref<1x8x5xf32, #tpu.memory_space<vmem>>, vector<1x8x5xf32>,
    return
  }
  func.func @transform_0(%arg0: i32) -> (i32, i32, i32) {
    %c0_i32 = arith.constant 0 : i32
    %c0_i32_0 = arith.constant 0 : i32
    %c0_i32_1 = arith.constant 0 : i32
    return %arg0, %c0_i32, %c0_i32_0 : i32, i32, i32
  }
  func.func @transform_1(%arg0: i32) -> (i32, i32, i32) {
    %c0_i32 = arith.constant 0 : i32
    %c0_i32_0 = arith.constant 0 : i32
    %c0_i32_1 = arith.constant 0 : i32
    %c0_i32_2 = arith.constant 0 : i32
    return %c0_i32, %c0_i32_0, %c0_i32_1 : i32, i32, i32
  }
  func.func @transform_2(%arg0: i32) -> (i32, i32) {
    %c0_i32 = arith.constant 0 : i32
    %c0_i32_0 = arith.constant 0 : i32
    %c0_i32_1 = arith.constant 0 : i32
    return %c0_i32, %c0_i32_0 : i32, i32
  }
  func.func @transform_3(%arg0: i32) -> (i32, i32) {
    %c0_i32 = arith.constant 0 : i32
    %c0_i32_0 = arith.constant 0 : i32
    %c0_i32_1 = arith.constant 0 : i32
    return %c0_i32, %c0_i32_0 : i32, i32
  }
  func.func @transform_4(%arg0: i32) -> (i32, i32, i32) {
    %c0_i32 = arith.constant 0 : i32
    %c0_i32_0 = arith.constant 0 : i32
    %c0_i32_1 = arith.constant 0 : i32
    %c0_i32_2 = arith.constant 0 : i32
    return %c0_i32, %c0_i32_0, %c0_i32_1 : i32, i32, i32
  }
  func.func @transform_5(%arg0: i32) -> (i32, i32) {
    %c0_i32 = arith.constant 0 : i32
    %c0_i32_0 = arith.constant 0 : i32
    %c0_i32_1 = arith.constant 0 : i32
    return %c0_i32, %c0_i32_0 : i32, i32
  }
  func.func @transform_6(%arg0: i32) -> (i32, i32) {
    %c0_i32 = arith.constant 0 : i32
    %c0_i32_0 = arith.constant 0 : i32
    %c0_i32_1 = arith.constant 0 : i32
    return %c0_i32, %c0_i32_0 : i32, i32
  }
  func.func @transform_7(%arg0: i32) -> (i32, i32, i32) {
    %c0_i32 = arith.constant 0 : i32
    %c0_i32_0 = arith.constant 0 : i32
    %c0_i32_1 = arith.constant 0 : i32
    %c0_i32_2 = arith.constant 0 : i32
    return %c0_i32, %c0_i32_0, %c0_i32_1 : i32, i32, i32
  }
  func.func @transform_8(%arg0: i32) -> (i32, i32) {
    %c0_i32 = arith.constant 0 : i32
    %c0_i32_0 = arith.constant 0 : i32
    %c0_i32_1 = arith.constant 0 : i32
    return %c0_i32, %c0_i32_0 : i32, i32
  }
  func.func @transform_9(%arg0: i32) -> (i32, i32) {
    %c0_i32 = arith.constant 0 : i32
    %c0_i32_0 = arith.constant 0 : i32
    %c0_i32_1 = arith.constant 0 : i32
    return %c0_i32, %c0_i32_0 : i32, i32
  }
  func.func @transform_10(%arg0: i32) -> (i32, i32) {
    %c0_i32 = arith.constant 0 : i32
    %c0_i32_0 = arith.constant 0 : i32
    %c0_i32_1 = arith.constant 0 : i32
    return %c0_i32, %c0_i32_0 : i32, i32
  }
  func.func @transform_11(%arg0: i32) -> (i32, i32) {
    %c0_i32 = arith.constant 0 : i32
    %c0_i32_0 = arith.constant 0 : i32
    %c0_i32_1 = arith.constant 0 : i32
    return %c0_i32, %c0_i32_0 : i32, i32
  }
  func.func @transform_12(%arg0: i32) -> (i32, i32) {
    %c0_i32 = arith.constant 0 : i32
    %c0_i32_0 = arith.constant 0 : i32
    %c0_i32_1 = arith.constant 0 : i32
    return %c0_i32, %c0_i32_0 : i32, i32
  }
  func.func @transform_13(%arg0: i32) -> (i32, i32) {
    %c0_i32 = arith.constant 0 : i32
    %c0_i32_0 = arith.constant 0 : i32
    %c0_i32_1 = arith.constant 0 : i32
    return %c0_i32, %c0_i32_0 : i32, i32
  }
  func.func @transform_14(%arg0: i32) -> (i32, i32) {
    %c0_i32 = arith.constant 0 : i32
    %c0_i32_0 = arith.constant 0 : i32
    %c0_i32_1 = arith.constant 0 : i32
    return %c0_i32, %c0_i32_0 : i32, i32
  }
  func.func @transform_15(%arg0: i32) -> (i32, i32) {
    %c0_i32 = arith.constant 0 : i32
    %c0_i32_0 = arith.constant 0 : i32
    %c0_i32_1 = arith.constant 0 : i32
    return %c0_i32, %c0_i32_0 : i32, i32
  }
  func.func @transform_16(%arg0: i32) -> (i32, i32) {
    %c0_i32 = arith.constant 0 : i32
    %c0_i32_0 = arith.constant 0 : i32
    %c0_i32_1 = arith.constant 0 : i32
    return %c0_i32, %c0_i32_0 : i32, i32
  }
  func.func @transform_17(%arg0: i32) -> (i32, i32) {
    %c0_i32 = arith.constant 0 : i32
    %c0_i32_0 = arith.constant 0 : i32
    %c0_i32_1 = arith.constant 0 : i32
    return %c0_i32, %c0_i32_0 : i32, i32
  }
  func.func @transform_18(%arg0: i32) -> (i32, i32) {
    %c0_i32 = arith.constant 0 : i32
    %c0_i32_0 = arith.constant 0 : i32
    %c0_i32_1 = arith.constant 0 : i32
    return %c0_i32, %c0_i32_0 : i32, i32
  }
  func.func @transform_19(%arg0: i32) -> (i32, i32, i32) {
    %c0_i32 = arith.constant 0 : i32
    %c0_i32_0 = arith.constant 0 : i32
    %c0_i32_1 = arith.constant 0 : i32
    return %arg0, %c0_i32, %c0_i32_0 : i32, i32, i32
  }
}

</mosaic_0001>

<bundles_post_ra>
// kernel: crnn_forward.1
= control target key start
LH: loop header
LB: loop body
LE: loop exit
PB: predicated region body
PF: predicated region fallthrough
CT: control target
= control target key end

     0   :  { %s3723_s0 = inlined_call_operand.hbm [shape: f32[2,8,60], index: 0, kind: input, shape index: {}]   ;;  %s3724_s1 = inlined_call_operand.hbm [shape: f32[3,60,240], index: 1, kind: input, shape index: {}]   ;;  %s3725_s2 = inlined_call_operand.vmem [shape: f32[1,240], index: 2, kind: input, shape index: {}]   ;;  %s3726_s3 = inlined_call_operand.vmem [shape: f32[1,240], index: 3, kind: input, shape index: {}]   ;;  %s3727_s4 = inlined_call_operand.hbm [shape: f32[3,48,48], index: 4, kind: input, shape index: {}]   ;;  %s3728_s5 = inlined_call_operand.vmem [shape: f32[1,48], index: 5, kind: input, shape index: {}]   ;;  %s3729_s6 = inlined_call_operand.hbm [shape: f32[1,48], index: 6, kind: input, shape index: {}]   ;;  %s3730_s7 = inlined_call_operand.vmem [shape: f32[3,24,24], index: 7, kind: input, shape index: {}]   ;;  %s3731_s8 = inlined_call_operand.vmem [shape: f32[1,24], index: 8, kind: input, shape index: {}]   ;;  %s3732_s9 = inlined_call_operand.hbm [shape: f32[1,24], index: 9, kind: input, shape index: {}]   ;;  %s3733_s10 = inlined_call_operand.vmem [shape: f32[12,192], index: 10, kind: input, shape index: {}]   ;;  %s3734_s11 = inlined_call_operand.hbm [shape: f32[1,192], index: 11, kind: input, shape index: {}]   ;;  %s3735_s12 = inlined_call_operand.hbm [shape: f32[64,192], index: 12, kind: input, shape index: {}]   ;;  %s3736_s13 = inlined_call_operand.hbm [shape: f32[1,192], index: 13, kind: input, shape index: {}]   ;;  %s3737_s14 = inlined_call_operand.hbm [shape: f32[1,192], index: 14, kind: input, shape index: {}]   ;;  %s3738_s15 = inlined_call_operand.vmem [shape: f32[64,32], index: 15, kind: input, shape index: {}]   ;;  %s3739_s16 = inlined_call_operand.hbm [shape: f32[1,32], index: 16, kind: input, shape index: {}]   ;;  %s3740_s17 = inlined_call_operand.vmem [shape: f32[32,5], index: 17, kind: input, shape index: {}]   ;;  %s3741_s18 = inlined_call_operand.hbm [shape: f32[1,5], index: 18, kind: input, shape index: {}]   ;;  %s3742_s19 = inlined_call_operand.vmem [shape: f32[2,8,5], index: 19, kind: output, shape index: {}]  }
   0x1   :  { %3748 = sst [smem:[#allocation31_spill]] %s3723_s0 }
   0x2   :  { %3749 = sst [smem:[#allocation32_spill]] %s3724_s1 }
   0x3   :  { %3750 = sst [smem:[#allocation33_spill]] %s3725_s2 }
   0x4   :  { %3751 = sst [smem:[#allocation34_spill]] %s3726_s3 }
   0x5   :  { %3752 = sst [smem:[#allocation35_spill]] %s3729_s6 }
   0x6   :  { %3753 = sst [smem:[#allocation36_spill]] %s3730_s7 }
   0x7   :  { %3754 = sst [smem:[#allocation37_spill]] %s3731_s8 }
   0x8   :  { %3755 = sst [smem:[#allocation38_spill]] %s3733_s10 }
   0x9   :  { %3756 = sst [smem:[#allocation39_spill]] %s3734_s11 }
   0xa   :  { %3757 = sst [smem:[#allocation40_spill]] %s3738_s15 }
   0xb   :  { %3758 = sst [smem:[#allocation41_spill]] %s3740_s17 }
   0xc   :  { %3759 = sst [smem:[#allocation42_spill]] %s3742_s19 }
   0xd   :  { %24 = vsyncpa [#allocation9], 0 }
   0xe   :  { %26 = vsyncpa [#allocation9 + $0x1], 0 }
   0xf   :  { %27 = vsyncpa [#allocation11], 0 }
  0x10   :  { %28 = vsyncpa [#allocation14], 0 }
  0x11   :  { %29 = vsyncpa [#allocation17], 0 }
  0x12   :  { %30 = vsyncpa [#allocation20], 0 }
  0x13   :  { %31 = vsyncpa [#allocation23], 0  ;;  %s3092_s0 = smov 0   ;;  %s3094_s30 = smov 0  }
  0x14   :  { %s3096_s20 = smov 0   ;;  %s3098_s21 = smov 0  }
  0x15 LB: > { %s3760_s2 = sld [smem:[#allocation32_spill]]  ;;  %s3116_s24 = sadd.s32 4294967295, %s2969_s21   ;;  %s2969_s21 = sphi %s3098_s21, %s3779_s21   ;;  %s2965_s20 = sphi %s3096_s20, %s3778_s20   ;;  %s2961_s30 = sphi %s3094_s30, %s3777_s30   ;;  %s2957_s0 = sphi %s3092_s0, %s3776_s0  }
  0x16   : > { %p2299_p0 = scmp.ge.s32.totalorder %s2969_s21, 1  ;;  %p58_p1 = scmp.eq.s32.totalorder %s3116_s24, 0 }
  0x17   : > { %p472_p2 = scmp.lt.s32.totalorder %s2969_s21, 3  ;;  %s2971_s3 = smov [#allocation10]  }
  0x18   : > { %s485_s26 = sshll.u32 %s2971_s3, 4  ;;  %s3762_s6 = sld [smem:[#allocation35_spill]]  ;;  %s486_s26 = int_to_ptr.vmem [resolvable:$true] %s485_s26 }
  0x19   : > { %p3121_p3 = pnand %p2299_p0, %p472_p2  ;;  %s3764_s11 = sld [smem:[#allocation39_spill]] }
  0x1a   : > { %s2972_s19 = smov [#allocation13]   ;;  %s2973_s15 = smov 256  }
  0x1b   : > { %s483_s23 = sshll.u32 %s3760_s2, 4  ;;  %p2422_p4 = pneg %p3121_p3  ;;  %s484_s23 = int_to_ptr.hbm [resolvable:$true] %s483_s23 }
  0x1c   : > { %s523_s17 = sshll.u32 %s2972_s19, 4  ;;  %s2974_s8 = smov 16   ;;  %s524_s17 = int_to_ptr.vmem [resolvable:$true] %s523_s17 }
  0x1d   : > { %p3132_p5 = pnand %p2422_p4, %p58_p1  ;;  %s2975_s22 = smov [#allocation16]  }
  0x1e   : > { %s521_s29 = sshll.u32 %s3762_s6, 4  ;;  %s580_s6 = sshll.u32 %s3736_s13, 4  ;;  %s522_s29 = int_to_ptr.hbm [resolvable:$true] %s521_s29  ;;  %s581_s6 = int_to_ptr.hbm [resolvable:$true] %s580_s6 }
  0x1f   : > { %s554_s3 = sshll.u32 %s3764_s11, 4  ;;  %s556_s2 = sshll.u32 %s2975_s22, 4  ;;  %s555_s3 = int_to_ptr.hbm [resolvable:$true] %s554_s3  ;;  %s557_s2 = int_to_ptr.vmem [resolvable:$true] %s556_s2 }
  0x20   : > { %2425 = dma.hbm_to_vmem [thread:$0]  (!%p3132_p5), %s484_s23, 6144, %s486_s26, [#allocation11], %s2973_s15, %s2973_s15, %s2974_s8  }
  0x21   : > { %2431 = dma.hbm_to_vmem [thread:$0]  (!%p3132_p5), %s522_s29, 16, %s524_s17, [#allocation14]  }
  0x22   : > { %2437 = dma.hbm_to_vmem [thread:$0]  (!%p3132_p5), %s555_s3, 32, %s557_s2, [#allocation17]  }
  0x23   : > { %s2976_s19 = smov [#allocation19]   ;;  %s607_s23 = sshll.u32 %s3739_s16, 4  ;;  %s608_s23 = int_to_ptr.hbm [resolvable:$true] %s607_s23 }
  0x24   : > { %s582_s11 = sshll.u32 %s2976_s19, 4  ;;  %s503_s29 = sshll.u32 %s3727_s4, 4  ;;  %s583_s11 = int_to_ptr.vmem [resolvable:$true] %s582_s11  ;;  %s504_s29 = int_to_ptr.hbm [resolvable:$true] %s503_s29 }
  0x25   : > { %2443 = dma.hbm_to_vmem [thread:$0]  (!%p3132_p5), %s581_s6, 32, %s583_s11, [#allocation20]  }
  0x26   : > { %s2977_s27 = smov [#allocation22]   ;;  %s2978_s3 = smov [#allocation12]  }
  0x27   : > { %s609_s28 = sshll.u32 %s2977_s27, 4  ;;  %s505_s22 = sshll.u32 %s2978_s3, 4  ;;  %s610_s28 = int_to_ptr.vmem [resolvable:$true] %s609_s28  ;;  %s506_s22 = int_to_ptr.vmem [resolvable:$true] %s505_s22 }
  0x28   : > { %2449 = dma.hbm_to_vmem [thread:$0]  (!%p3132_p5), %s608_s23, 16, %s610_s28, [#allocation23]  }
  0x29   : > { %s2979_s7 = smov 128   ;;  %s2980_s10 = smov 8  }
  0x2a   : > { %2428 = dma.hbm_to_vmem [thread:$0]  (!%p3132_p5), %s504_s29, 2304, %s506_s22, [#allocation11], %s2979_s7, %s2979_s7, %s2980_s10  }
  0x2b   : > { %s539_s2 = sshll.u32 %s3732_s9, 4  ;;  %s2981_s19 = smov [#allocation15]   ;;  %s540_s2 = int_to_ptr.hbm [resolvable:$true] %s539_s2 }
  0x2c   : > { %s541_s17 = sshll.u32 %s2981_s19, 4  ;;  %s565_s23 = sshll.u32 %s3735_s12, 4  ;;  %s542_s17 = int_to_ptr.vmem [resolvable:$true] %s541_s17  ;;  %s566_s23 = int_to_ptr.hbm [resolvable:$true] %s565_s23 }
  0x2d   : > { %2434 = dma.hbm_to_vmem [thread:$0]  (!%p3132_p5), %s540_s2, 16, %s542_s17, [#allocation14]  }
  0x2e   : > { %s2982_s28 = smov [#allocation18]   ;;  %s592_s7 = sshll.u32 %s3737_s14, 4  ;;  %s593_s7 = int_to_ptr.hbm [resolvable:$true] %s592_s7 }
  0x2f   : > { %s567_s29 = sshll.u32 %s2982_s28, 4  ;;  %s622_s11 = sshll.u32 %s3741_s18, 4  ;;  %s568_s29 = int_to_ptr.vmem [resolvable:$true] %s567_s29  ;;  %s623_s11 = int_to_ptr.hbm [resolvable:$true] %s622_s11 }
  0x30   : > { %2440 = dma.hbm_to_vmem [thread:$0]  (!%p3132_p5), %s566_s23, 2048, %s568_s29, [#allocation17], %s2973_s15, %s2973_s15, %s2974_s8  }
  0x31   : > { %s2983_s2 = smov [#allocation21]   ;;  %s2984_s17 = smov [#allocation24]  }
  0x32   : > { %s594_s19 = sshll.u32 %s2983_s2, 4  ;;  %s624_s8 = sshll.u32 %s2984_s17, 4  ;;  %s595_s19 = int_to_ptr.vmem [resolvable:$true] %s594_s19  ;;  %s625_s8 = int_to_ptr.vmem [resolvable:$true] %s624_s8 }
  0x33   : > { %2446 = dma.hbm_to_vmem [thread:$0]  (!%p3132_p5), %s593_s7, 32, %s595_s19, [#allocation20]  }
  0x34   : > { %2452 = dma.hbm_to_vmem [thread:$0]  (!%p3132_p5), %s623_s11, 16, %s625_s8, [#allocation23]  }
  0x35   : > { %s3187_s15 = sadd.s32 1, %s2969_s21   ;;  %s44_s27 = sadd.s32 1, %s2965_s20 }
  0x36   : > { %s41_s26 = ssub.s32 %s2969_s21, %s3187_s15  ;;  %p51_p7 = scmp.ne.s32.totalorder %s2965_s20, %s2961_s30 }
  0x37   : > { %p42_p6 = scmp.eq.s32.totalorder %s41_s26, 0  ;;  %p52_p8 = scmp.eq.s32.totalorder %s2969_s21, 0 }
  0x38   : > { %p57_p9 = scmp.ne.s32.totalorder %s2961_s30, %s2957_s0  ;;  %p2467_p11 = scmp.lt.s32.totalorder %s2969_s21, 2 }
  0x39   : > { %s3198_s23 = scalar_select %p42_p6, %s2965_s20, %s44_s27  }
  0x3a   : > { %p3202_p10 = por %p58_p1, %p57_p9  ;;  %s635_s29 = sand.u32 1, %s2965_s20  }
  0x3b   : > { %s2312_s1 = sshll.u32 %s2969_s21, 3  ;;  %p53_p12 = por %p52_p8, %p51_p7 }
  0x3c   : > { %s2311_s3 = sshll.u32 %s635_s29, 3  ;;  %s3766_s10 = sld [smem:[#allocation31_spill]] }
  0x3d   : > { %s639_s2 = scalar_lea.vmem [#allocation8], %s2311_s3  ;;  %p3212_p13 = pnand %p2467_p11, %p53_p12 }
  0x3e   : > { %s647_s19 = sshll.u32 %s639_s2, 4  ;;  %s636_s17 = scalar_lea.sflag [#allocation9], %s635_s29  ;;  %s648_s19 = int_to_ptr.vmem [resolvable:$true] %s647_s19 }
  0x3f   : > { %p2889_p2 = pneg %p3212_p13 }
  0x42   : > { %s643_s6 = scalar_lea.hbm %s3766_s10, %s2312_s1  ;;  %s2892_s1 = scalar_lea.hbm %s3766_s10, 16 }
  0x43   : > { %s645_s11 = sshll.u32 %s643_s6, 4  ;;  %s646_s11 = int_to_ptr.hbm [resolvable:$true] %s645_s11 }
  0x44   : > { %s2885_s8 = sshra.s32 %s646_s11, 4  ;;  %s2886_s8 = int_to_ptr.hbm [resolvable:$true] %s2885_s8 }
  0x45   : > { %s2887_s21 = scalar_lea.hbm %s2886_s8, 8  ;;  %p2893_p6 = scmp.lt.s32.totalorder %s2886_s8, %s3766_s10 }
  0x46   : > { %p2888_p0 = scmp.ne.s32.totalorder %s2886_s8, %s2887_s21  ;;  %p2894_p7 = scmp.lt.s32.totalorder %s2892_s1, %s2887_s21 }
  0x48   : > { %p2890_p4 = pnand %p2889_p2, %p2888_p0  ;;  %p2895_p8 = por %p2894_p7, %p2893_p6 }
  0x4a   : > { %p2891_p5 = pneg %p2890_p4 }
  0x4c   : > { %p2896_p9 = pnand %p2895_p8, %p2891_p5 }
  0x4e   : > { %2899 = shalt.err (!%p2896_p9)
}
  0x4f   : > { %2456 = dma.hbm_to_vmem [thread:$0]  (!%p3212_p13), %s646_s11, 128, %s648_s19, %s636_s17  }
  0x50   : > { %656 = sbr.rel (%p3121_p3) target bundleno = 4440 (0x1158), region = 96  ;;  %s658_s29 = sand.u32 (!%p3121_p3), 1, %s2961_s30  }
  0x51   : > { %s3229_s7 = sshll.u32 (!%p3121_p3), %s658_s29, 3  ;;  %s659_s6 = scalar_lea.sflag (!%p3121_p3), [#allocation9], %s658_s29 }
  0x52   : > { %s662_s2 = scalar_lea.vmem (!%p3121_p3), [#allocation8], %s3229_s7 }
  0x55   : > { %2932 = dma.done.wait (%p3202_p10), %s659_s6, 128  }
  0x56   : > { %2934 = vsyncadd (%p3202_p10), %s659_s6, 4294967168 }
  0x57   : > { %2936 = dma.done.wait (%p58_p1), [#allocation11], 8448  }
  0x58   : > { %2938 = vsyncadd (%p58_p1), [#allocation11], 4294958848 }
  0x59   : > { %2940 = dma.done.wait (%p58_p1), [#allocation14], 32  }
  0x5a   : > { %2942 = vsyncadd (%p58_p1), [#allocation14], 4294967264 }
  0x5b   : > { %2944 = dma.done.wait (%p58_p1), [#allocation17], 2080  }
  0x5c   : > { %2946 = vsyncadd (%p58_p1), [#allocation17], 4294965216 }
  0x5d   : > { %2948 = dma.done.wait (%p58_p1), [#allocation20], 64  }
  0x5e   : > { %2950 = vsyncadd (%p58_p1), [#allocation20], 4294967232 }
  0x5f   : > { %2952 = dma.done.wait (%p58_p1), [#allocation23], 32  }
  0x60   : > { %2954 = vsyncadd (%p58_p1), [#allocation23], 4294967264  ;;  %vm771_vm0 = vcmask 490496   ;;  %vm773_vm1 = vcmask 484352   ;;  %v2985_v0 = vmov 0.0   ;;  %vm815_vm2 = vcmask 1043456  }
  0x61   : > { %772 = vst.msk [vmem:[#allocation2] sm:$0xff] %vm771_vm0, %v2985_v0  ;;  %v810_v1 = vld [vmem:[#allocation10 + $0xf0] sm:$0xf]  ;;  %v811_v2 = vld [vmem:[#allocation10 + $0xf8] sm:$0xf]  ;;  %v808_v4 = vld [vmem:[#allocation10 + $0xe0] sm:$0xff] }
  0x62   : > { %774 = vst.msk [vmem:[#allocation2 + $0x8] sm:$0x3] %vm773_vm1, %v2985_v0  ;;  %v792_v3 = vld [vmem:[#allocation10 + $0x70] sm:$0xf]  ;;  %2326 = vmatpush.msk.msra.mxu0 %vm815_vm2, %v810_v1  ;;  %2328 = vmatpush.msk.msra.mxu1 %vm815_vm2, %v811_v2  ;;  %v809_v5 = vld [vmem:[#allocation10 + $0xe8] sm:$0xff]  ;;  %v790_v6 = vld [vmem:[#allocation10 + $0x60] sm:$0xff] }
  0x63   : > { %2330 = vmatpush.msk.msra.mxu2 %vm815_vm2, %v792_v3  ;;  %v806_v7 = vld [vmem:[#allocation10 + $0xd0] sm:$0xff]  ;;  %v807_v8 = vld [vmem:[#allocation10 + $0xd8] sm:$0xff]  ;;  %v804_v11 = vld [vmem:[#allocation10 + $0xc0] sm:$0xff]  ;;  %s3768_s11 = sld [smem:[#allocation33_spill]]  ;;  %s2986_s8 = smov 80   ;;  %vm1020_vm3 = vcmask 392192  }
  0x64   : > { %v793_v9 = vld [vmem:[#allocation10 + $0x78] sm:$0xf]  ;;  %831 = vmatpush.msra.mxu0 %v808_v4  ;;  %851 = vmatpush.msra.mxu1 %v809_v5  ;;  %v788_v10 = vld [vmem:[#allocation10 + $0x50] sm:$0xff]  ;;  %v805_v12 = vld [vmem:[#allocation10 + $0xc8] sm:$0xff]  ;;  %s3769_s17 = sld [smem:[#allocation34_spill]]  ;;  %s2987_s21 = smov 64  }
  0x65   : > { %880 = vmatpush.msra.mxu2 %v790_v6  ;;  %2332 = vmatpush.msk.msra.mxu3 %vm815_vm2, %v793_v9  ;;  %v791_v13 = vld [vmem:[#allocation10 + $0x68] sm:$0xff]  ;;  %v786_v14 = vld [vmem:[#allocation10 + $0x40] sm:$0xff]  ;;  %v789_v15 = vld [vmem:[#allocation10 + $0x58] sm:$0xff]  ;;  %s2988_s26 = smov 32   ;;  %s2989_s27 = smov 112   ;;  %vm1022_vm4 = vcmask 386048  }
  0x66   : > { %832 = vmatpush.msra.mxu0 %v806_v7  ;;  %852 = vmatpush.msra.mxu1 %v807_v8  ;;  %v802_v16 = vld [vmem:[#allocation10 + $0xb0] sm:$0xff]  ;;  %v803_v17 = vld [vmem:[#allocation10 + $0xb8] sm:$0xff]  ;;  %v787_v19 = vld [vmem:[#allocation10 + $0x48] sm:$0xff]  ;;  %1021 = vst.msk [vmem:[#allocation3] sm:$0xff] %vm1020_vm3, %v2985_v0  ;;  %vm1008_vm5 = vcmask 261120   ;;  %s2990_s22 = smov 104  }
  0x67   : > { %881 = vmatpush.msra.mxu2 %v788_v10  ;;  %900 = vmatpush.msra.mxu3 %v791_v13  ;;  %v784_v18 = vld [vmem:[#allocation10 + $0x30] sm:$0xff]  ;;  %v800_v20 = vld [vmem:[#allocation10 + $0xa0] sm:$0xff]  ;;  %v801_v21 = vld [vmem:[#allocation10 + $0xa8] sm:$0xff]  ;;  %1023 = vst.msk [vmem:[#allocation3 + $0x8] sm:$0x3] %vm1022_vm4, %v2985_v0  ;;  %s3770_s6 = sld [smem:[#allocation36_spill]] }
  0x68   : > { %833 = vmatpush.msra.mxu0 %v804_v11  ;;  %853 = vmatpush.msra.mxu1 %v805_v12  ;;  %v782_v22 = vld [vmem:[#allocation10 + $0x20] sm:$0xff]  ;;  %v785_v23 = vld [vmem:[#allocation10 + $0x38] sm:$0xff]  ;;  %v798_v24 = vld [vmem:[#allocation10 + $0x90] sm:$0xff]  ;;  %vm1134_vm6 = vcmask 195584   ;;  %vm1136_vm7 = vcmask 189440   ;;  %s3771_s19 = sld [smem:[#allocation38_spill]] }
  0x69   : > { %882 = vmatpush.msra.mxu2 %v786_v14  ;;  %901 = vmatpush.msra.mxu3 %v789_v15  ;;  %v799_v25 = vld [vmem:[#allocation10 + $0x98] sm:$0xff]  ;;  %v780_v27 = vld [vmem:[#allocation10 + $0x10] sm:$0xff]  ;;  %v783_v28 = vld [vmem:[#allocation10 + $0x28] sm:$0xff]  ;;  %1135 = vst.msk [vmem:[#allocation4] sm:$0xff] %vm1134_vm6, %v2985_v0  ;;  %s2991_s29 = smov 116   ;;  %vm1249_vm8 = vcmask 97280  }
  0x6a   : > { %834 = vmatpush.msra.mxu0 %v802_v16  ;;  %854 = vmatpush.msra.mxu1 %v803_v17  ;;  %v775_v26 = vld [vmem:[%s662_s2] sm:$0xff]  ;;  %v796_v29 = vld [vmem:[#allocation10 + $0x80] sm:$0xff]  ;;  %v797_v30 = vld [vmem:[#allocation10 + $0x88] sm:$0xff]  ;;  %1137 = vst.msk [vmem:[#allocation4 + $0x8] sm:$0x3] %vm1136_vm7, %v2985_v0  ;;  %vm1300_vm9 = vcmask 523264  }
  0x6b   : > { %883 = vmatpush.msra.mxu2 %v784_v18  ;;  %902 = vmatpush.msra.mxu3 %v787_v19  ;;  %776 = vst.msk [vmem:[#allocation2 + $0x1] sm:$0xff] %vm771_vm0, %v775_v26  ;;  %v778_v31 = vld [vmem:[#allocation10] sm:$0xff]  ;;  %v927_v32 = vld [vmem:[#allocation10 + $0x170] sm:$0xf]  ;;  %v928_v33 = vld [vmem:[#allocation10 + $0x178] sm:$0xf] }
  0x6c   : > { %835 = vmatpush.msra.mxu0 %v800_v20  ;;  %855 = vmatpush.msra.mxu1 %v801_v21  ;;  %v781_v34 = vld [vmem:[#allocation10 + $0x18] sm:$0xff]  ;;  %v925_v35 = vld [vmem:[#allocation10 + $0x160] sm:$0xff]  ;;  %v926_v36 = vld [vmem:[#allocation10 + $0x168] sm:$0xff]  ;;  %vm1414_vm14 = vcmask 253952   ;;  %p767_p1 = scmp.lt.s32.totalorder %s3116_s24, 1  ;;  %s3775_s28 = sld [smem:[#allocation42_spill]] }
  0x6d   : > { %884 = vmatpush.msra.mxu2 %v782_v22  ;;  %903 = vmatpush.msra.mxu3 %v785_v23  ;;  %v779_v37 = vld [vmem:[#allocation10 + $0x8] sm:$0xff]  ;;  %v923_v38 = vld [vmem:[#allocation10 + $0x150] sm:$0xff]  ;;  %v924_v40 = vld [vmem:[#allocation10 + $0x158] sm:$0xff] }
  0x6e   : > { %836 = vmatpush.msra.mxu0 %v798_v24  ;;  %856 = vmatpush.msra.mxu1 %v799_v25  ;;  %v921_v41 = vld [vmem:[#allocation10 + $0x140] sm:$0xff]  ;;  %v922_v43 = vld [vmem:[#allocation10 + $0x148] sm:$0xff]  ;;  %v919_v44 = vld [vmem:[#allocation10 + $0x130] sm:$0xff]  ;;  %s3781_s24 = smov (!%p767_p1, %s3116_s24), 1 }
  0x6f   : > { %885 = vmatpush.msra.mxu2 %v780_v27  ;;  %904 = vmatpush.msra.mxu3 %v783_v28  ;;  %v920_v45 = vld [vmem:[#allocation10 + $0x138] sm:$0xff]  ;;  %v917_v46 = vld [vmem:[#allocation10 + $0x120] sm:$0xff]  ;;  %v918_v47 = vld [vmem:[#allocation10 + $0x128] sm:$0xff]  ;;  %s2325_s7 = sshll.u32 %s3781_s24, 3 }
  0x70   : > { %837 = vmatpush.msra.mxu0 %v796_v29  ;;  %857 = vmatpush.msra.mxu1 %v797_v30  ;;  %v915_v48 = vld [vmem:[#allocation10 + $0x110] sm:$0xff]  ;;  %v916_v49 = vld [vmem:[#allocation10 + $0x118] sm:$0xff]  ;;  %v913_v50 = vld [vmem:[#allocation10 + $0x100] sm:$0xff] }
  0x71   : > { %886 = vmatpush.msra.mxu2 %v778_v31  ;;  %905 = vmatpush.msra.mxu3 %v781_v34  ;;  %v914_v51 = vld [vmem:[#allocation10 + $0x108] sm:$0xff]  ;;  %v980_v56 = vld [vmem:[%s3768_s11] sm:$0x3]  ;;  %v1039_v12 = vld [vmem:[#allocation12 + $0x58] sm:$0xff]  ;;  %s3773_s11 = sld [smem:[#allocation40_spill]] }
  0x72   : > { %2334 = vmatpush.msk.msrb.mxu0 %vm815_vm2, %v927_v32  ;;  %2336 = vmatpush.msk.msrb.mxu1 %vm815_vm2, %v928_v33  ;;  %v777_v39 = vld [vmem:[#allocation2] sm:$0xff]  ;;  %v982_v60 = vperm.slane %v980_v56, 0  ;;  %v983_v63 = vperm.slane %v980_v56, 1  ;;  %v1038_v13 = vld [vmem:[#allocation12 + $0x50] sm:$0xff]  ;;  %v1031_v14 = vld [vmem:[#allocation12 + $0x28] sm:$0xff]  ;;  %s770_s0 = scalar_lea.vmem %s3775_s28, %s2325_s7 }
  0x73   : > { %2331 = vmatmul.msk.f32.vlgmr.msra.gmra.mxu2 %vm771_vm0, %v777_v39  ;;  %v794_v42 = vld [vmem:[#allocation2 + $0x1] sm:$0xff]  ;;  %906 = vmatpush.msra.mxu3 %v779_v37  ;;  %v1029_v18 = vld [vmem:[#allocation12 + $0x18] sm:$0xff]  ;;  %v1028_v20 = vld [vmem:[#allocation12 + $0x10] sm:$0xff] }
  0x74   : > { %947 = vmatpush.msrb.mxu0 %v925_v35  ;;  %967 = vmatpush.msrb.mxu1 %v926_v36  ;;  %v911_v52 = vld [vmem:[#allocation2 + $0x2] sm:$0xff]  ;;  %v988_v58 = vld [vmem:[%s3769_s17] sm:$0x3]  ;;  %v1035_v19 = vld [vmem:[#allocation12 + $0x38] sm:$0xff] }
  0x75   : > { %2333 = vmatmul.msk.f32.vlgmr.msra.gmra.mxu3 %vm771_vm0, %v777_v39  ;;  %2329 = vmatmul.msk.f32.vlgmr.msra.gmra.mxu1 %vm771_vm0, %v794_v42  ;;  %v990_v3 = vperm.slane %v988_v58, 0  ;;  %v991_v5 = vperm.slane %v988_v58, 1  ;;  %v1037_v15 = vld [vmem:[#allocation12 + $0x48] sm:$0xff]  ;;  %v1030_v16 = vld [vmem:[#allocation12 + $0x20] sm:$0xff]  ;;  %v1034_v21 = vld [vmem:[#allocation12 + $0x30] sm:$0xff] }
  0x76   : > { %948 = vmatpush.msrb.mxu0 %v923_v38  ;;  %968 = vmatpush.msrb.mxu1 %v924_v40  ;;  %v1036_v17 = vld [vmem:[#allocation12 + $0x40] sm:$0xff]  ;;  %v1027_v22 = vld [vmem:[#allocation12 + $0x8] sm:$0xff]  ;;  %v1091_v26 = vld [vmem:[#allocation12 + $0x78] sm:$0xff] }
  0x77   : > { %2327 = vmatmul.msk.f32.vlgmr.msra.gmra.mxu0 %vm771_vm0, %v794_v42  ;;  %1053 = vmatpush.msrb.mxu2 %v1039_v12  ;;  %v1093_v23 = vld [vmem:[#allocation12 + $0x88] sm:$0xff]  ;;  %v1026_v24 = vld [vmem:[#allocation12] sm:$0xff]  ;;  %v1090_v27 = vld [vmem:[#allocation12 + $0x70] sm:$0xff] }
  0x78   : > { %949 = vmatpush.msrb.mxu0 %v921_v41  ;;  %969 = vmatpush.msrb.mxu1 %v922_v43  ;;  %v1092_v25 = vld [vmem:[#allocation12 + $0x80] sm:$0xff]  ;;  %v1089_v28 = vld [vmem:[#allocation12 + $0x68] sm:$0xff] }
  0x79   : > { %1054 = vmatpush.msrb.mxu2 %v1038_v13  ;;  %1076 = vmatpush.msrb.mxu3 %v1031_v14  ;;  %v1088_v29 = vld [vmem:[#allocation12 + $0x60] sm:$0xff]  ;;  %v1141_v56 = vld [vmem:[%s3770_s6 + $0x8] sm:$0xff]  ;;  %v2534_v13 = vld [vmem:[#allocation15] ss:$0 sm:$0xff] }
  0x7a   : > { %950 = vmatpush.msrb.mxu0 %v919_v44  ;;  %970 = vmatpush.msrb.mxu1 %v920_v45  ;;  %v1140_v58 = vld [vmem:[%s3770_s6] sm:$0xff] }
  0x7b   : > { %1055 = vmatpush.msrb.mxu2 %v1037_v15  ;;  %1077 = vmatpush.msrb.mxu3 %v1030_v16 }
  0x7c   : > { %951 = vmatpush.msrb.mxu0 %v917_v46  ;;  %971 = vmatpush.msrb.mxu1 %v918_v47  ;;  %v2531_v46 = vld [vmem:[%s3728_s5] ss:$0 sm:$0xff] }
  0x7d   : > { %1056 = vmatpush.msrb.mxu2 %v1036_v17  ;;  %1078 = vmatpush.msrb.mxu3 %v1029_v18  ;;  %v1240_v17 = vld [vmem:[%s3771_s19 + $0x8] sm:$0xff] }
  0x7e   : > { %952 = vmatpush.msrb.mxu0 %v915_v48  ;;  %972 = vmatpush.msrb.mxu1 %v916_v49  ;;  %v2532_v49 = vld [vmem:[#allocation13] ss:$0 sm:$0xff]  ;;  %v3350_v18 = vld [vmem:[#allocation18 + $0x70] sm:$0xff] }
  0x7f   : > { %1057 = vmatpush.msrb.mxu2 %v1035_v19  ;;  %1079 = vmatpush.msrb.mxu3 %v1028_v20  ;;  %v3352_v19 = vld [vmem:[#allocation18 + $0x60] sm:$0xff]  ;;  %v3356_v20 = vld [vmem:[#allocation18 + $0x50] sm:$0xff] }
  0x80   : > { %953 = vmatpush.msrb.mxu0 %v913_v50  ;;  %973 = vmatpush.msrb.mxu1 %v914_v51 }
  0x81   : > { %2335 = vmatmul.msk.f32.vlgmr.msrb.gmra.mxu0 %vm771_vm0, %v911_v52  ;;  %2337 = vmatmul.msk.f32.vlgmr.msrb.gmra.mxu1 %vm771_vm0, %v911_v52 }
  0x82   : > { %1058 = vmatpush.msrb.mxu2 %v1034_v21  ;;  %1080 = vmatpush.msrb.mxu3 %v1027_v22  ;;  %v3358_v21 = vld [vmem:[#allocation18 + $0x78] sm:$0xff]  ;;  %v3362_v22 = vld [vmem:[#allocation18 + $0x68] sm:$0xff] }
  0x83   : > { %1343 = vmatpush.msra.mxu1 %v3350_v18 }
  0x84   : > { %1107 = vmatpush.msra.mxu2 %v1093_v23  ;;  %1081 = vmatpush.msrb.mxu3 %v1026_v24  ;;  %v3364_v23 = vld [vmem:[#allocation18 + $0x40] sm:$0xff]  ;;  %v3366_v24 = vld [vmem:[#allocation18 + $0x58] sm:$0xff] }
  0x85   : > { %1344 = vmatpush.msra.mxu1 %v3352_v19 }
  0x86   : > { %1108 = vmatpush.msra.mxu2 %v1092_v25  ;;  %v3372_v25 = vld [vmem:[#allocation18 + $0x30] sm:$0xff] }
  0x87   : > { %1345 = vmatpush.msra.mxu1 %v3356_v20 }
  0x88   : > { %1109 = vmatpush.msra.mxu2 %v1091_v26  ;;  %v3374_v26 = vld [vmem:[#allocation18 + $0x48] sm:$0xff] }
  0x89   : > { %1346 = vmatpush.msra.mxu1 %v3364_v23 }
  0x8a   : > { %1110 = vmatpush.msra.mxu2 %v1090_v27  ;;  %v3380_v27 = vld [vmem:[#allocation18 + $0x20] sm:$0xff] }
  0x8b   : > { %1347 = vmatpush.msra.mxu1 %v3372_v25 }
  0x8c   : > { %1111 = vmatpush.msra.mxu2 %v1089_v28  ;;  %v3382_v28 = vld [vmem:[#allocation18 + $0x38] sm:$0xff] }
  0x8d   : > { %1348 = vmatpush.msra.mxu1 %v3380_v27 }
  0x8e   : > { %1112 = vmatpush.msra.mxu2 %v1088_v29  ;;  %v3388_v29 = vld [vmem:[#allocation18 + $0x10] sm:$0xff] }
  0x8f   : > { %1349 = vmatpush.msra.mxu1 %v3388_v29 }
  0xf2   : > { %v859_v53 = vpop.f32.mrf.mxu1 }
  0xf4   : > { %v839_v54 = vpop.f32.mrf.mxu0 }
  0xf6   : > { %v888_v55 = vpop.f32.mrf.mxu2 }
  0xf7   : > { %v889_v59 = vadd.f32 %v888_v55, %v839_v54  ;;  %v2342_v54 = vld [vmem:[%s3770_s6 + $0x20] sm:$0xff]  ;;  %v1142_v55 = vld [vmem:[%s3770_s6 + $0x10] sm:$0xff] }
  0xf8   : > { %v908_v57 = vpop.f32.mrf.mxu3  ;;  %1187 = vmatpush.msra.mxu0 %v1142_v55 }
  0xf9   : > { %v909_v61 = vadd.f32 %v908_v57, %v859_v53  ;;  %v2343_v53 = vld [vmem:[%s3770_s6 + $0x28] sm:$0xff]  ;;  %v2341_v57 = vld [vmem:[%s3770_s6 + $0x18] sm:$0xff] }
  0xfa   : > { %1164 = vmatpush.msra.mxu3 %v2343_v53  ;;  %1188 = vmatpush.msra.mxu0 %v1141_v56 }
  0xfc   : > { %1165 = vmatpush.msra.mxu3 %v2342_v54  ;;  %1189 = vmatpush.msra.mxu0 %v1140_v58 }
  0xfe   : > { %v955_v62 = vpop.f32.mrf.mxu0  ;;  %v975_v2 = vpop.f32.mrf.mxu1  ;;  %1166 = vmatpush.msra.mxu3 %v2341_v57 }
  0xff   : > { %v978_v1 = vadd.f32 %v955_v62, %v889_v59  ;;  %v979_v4 = vadd.f32 %v975_v2, %v909_v61  ;;  %v2348_v59 = vld [vmem:[%s3770_s6 + $0x40] sm:$0xff]  ;;  %v2346_v61 = vld [vmem:[%s3770_s6 + $0x30] sm:$0xff] }
 0x101   : > { %v986_v6 = vmul.f32 %v982_v60, %v978_v1  ;;  %v987_v7 = vmul.f32 %v983_v63, %v979_v4  ;;  %v2347_v60 = vld [vmem:[%s3770_s6 + $0x38] sm:$0xff]  ;;  %v1241_v4 = vld [vmem:[%s3771_s19 + $0x10] sm:$0xf] }
 0x103   : > { %v994_v8 = vadd.f32 %v990_v3, %v986_v6  ;;  %v995_v9 = vadd.f32 %v991_v5, %v987_v7  ;;  %v1239_v5 = vld [vmem:[%s3771_s19] sm:$0xff]  ;;  %v1242_v6 = vld [vmem:[%s3771_s19 + $0x18] sm:$0xf] }
 0x104   : > { %2352 = vmatpush.msk.msrb.mxu0 %vm815_vm2, %v1242_v6 }
 0x105   : > { %v996_v10 = vmax.f32 %v994_v8, 0.0  ;;  %v997_v11 = vmax.f32 %v995_v9, 0.0 }
 0x106   : > { %1294 = vmatpush.msrb.mxu0 %v1240_v17 }
 0x107   : > { %999 = vrot.lane.b32.xlu0 %v996_v10, %s2986_s8  ;;  %1016 = vrot.lane.b32.xlu2 %v997_v11, %s2987_s21 }
 0x108   : > { %1006 = vrot.lane.b32.xlu1 %v997_v11, %s2988_s26 }
 0x10f   : > { %1004 = vrot.lane.b32.xlu0 %v996_v10, %s2988_s26 }
 0x110   : > { %1012 = vrot.lane.b32.xlu1 %v997_v11, %s2989_s27  ;;  %s3774_s27 = sld [smem:[#allocation41_spill]] }
 0x161   : > { %v1017_v38 = vpop.permute.xlu2 %1016 }
 0x179   : > { %v1000_v30 = vpop.permute.xlu0 %999 }
 0x17a   : > { %v1007_v31 = vpop.permute.xlu1 %1006  ;;  %v1002_v32 = vmax.f32 %v996_v10, %v1000_v30  ;;  %v3390_v30 = vld [vmem:[#allocation18 + $0x28] sm:$0xff] }
 0x181   : > { %v1005_v33 = vpop.permute.xlu0 %1004 }
 0x182   : > { %v1009_v34 = vsel %vm1008_vm5, %v1005_v33, %v1007_v31  ;;  %v1013_v36 = vpop.permute.xlu1 %1012  ;;  %v3396_v31 = vld [vmem:[#allocation18] sm:$0xff]  ;;  %v3404_v33 = vld [vmem:[#allocation18 + $0x8] sm:$0xff] }
 0x183   : > { %v1011_v35 = vmax.f32 %v1002_v32, %v1009_v34  ;;  %v3398_v32 = vld [vmem:[#allocation18 + $0x18] sm:$0xff]  ;;  %1350 = vmatpush.msra.mxu1 %v3396_v31 }
 0x184   : > { %1351 = vmatmul.f32.vlgmr.msra.gmra.mxu1 %v2985_v0 }
 0x185   : > { %v1015_v37 = vmax.f32 %v1011_v35, %v1013_v36  ;;  %1530 = vmatpush.msrb.mxu1 %v3350_v18  ;;  %v1243_v35 = vld [vmem:[#allocation16] sm:$0x3] }
 0x186   : > { %v1246_v36 = vperm.slane %v1243_v35, 1 }
 0x187   : > { %v1019_v39 = vmax.f32 %v1015_v37, %v1017_v38  ;;  %1531 = vmatpush.msrb.mxu1 %v3352_v19 }
 0x189   : > { %1024 = vst.msk [vmem:[#allocation3 + $0x1] sm:$0xff] %vm1020_vm3, %v1019_v39  ;;  %1532 = vmatpush.msrb.mxu1 %v3356_v20  ;;  %v1245_v39 = vperm.slane %v1243_v35, 0 }
 0x18b   : > { %1533 = vmatpush.msrb.mxu1 %v3364_v23 }
 0x18d   : > { %1534 = vmatpush.msrb.mxu1 %v3372_v25 }
 0x18f   : > { %1535 = vmatpush.msrb.mxu1 %v3380_v27 }
 0x190   : > { %v1032_v40 = vld [vmem:[#allocation3 + $0x1] sm:$0xff] }
 0x191   : > { %v1025_v41 = vld [vmem:[#allocation3] sm:$0xff]  ;;  %2338 = vmatmul.msk.f32.vlgmr.msrb.gmra.mxu2 %vm1020_vm3, %v1032_v40  ;;  %1536 = vmatpush.msrb.mxu1 %v3388_v29 }
 0x192   : > { %2339 = vmatmul.msk.f32.vlgmr.msrb.gmra.mxu3 %vm1020_vm3, %v1025_v41  ;;  %v1086_v42 = vld [vmem:[#allocation3 + $0x2] sm:$0xff]  ;;  %1363 = vmatpush.msrb.mxu2 %v3358_v21 }
 0x193   : > { %1215 = vmatpush.msrb.mxu3 %v2348_v59  ;;  %1537 = vmatpush.msrb.mxu1 %v3396_v31 }
 0x194   : > { %1364 = vmatpush.msrb.mxu2 %v3362_v22 }
 0x195   : > { %1216 = vmatpush.msrb.mxu3 %v2347_v60  ;;  %1714 = vmatpush.msra.mxu1 %v3350_v18 }
 0x196   : > { %1365 = vmatpush.msrb.mxu2 %v3366_v24 }
 0x197   : > { %1217 = vmatpush.msrb.mxu3 %v2346_v61  ;;  %1715 = vmatpush.msra.mxu1 %v3352_v19 }
 0x198   : > { %1366 = vmatpush.msrb.mxu2 %v3374_v26 }
 0x199   : > { %2340 = vmatmul.msk.f32.vlgmr.msra.gmra.mxu2 %vm1020_vm3, %v1086_v42  ;;  %1716 = vmatpush.msra.mxu1 %v3356_v20  ;;  %v1318_v42 = vld [vmem:[#allocation19] sm:$0x3] }
 0x19a   : > { %1367 = vmatpush.msrb.mxu2 %v3382_v28 }
 0x19b   : > { %1717 = vmatpush.msra.mxu1 %v3364_v23 }
 0x19c   : > { %1368 = vmatpush.msrb.mxu2 %v3390_v30 }
 0x19d   : > { %1718 = vmatpush.msra.mxu1 %v3372_v25 }
 0x19e   : > { %1369 = vmatpush.msrb.mxu2 %v3398_v32 }
 0x19f   : > { %1719 = vmatpush.msra.mxu1 %v3380_v27 }
 0x1a0   : > { %1370 = vmatpush.msrb.mxu2 %v3404_v33 }
 0x1a1   : > { %1371 = vmatmul.f32.vlgmr.msrb.gmra.mxu2 %v2985_v0  ;;  %1720 = vmatpush.msra.mxu1 %v3388_v29 }
 0x1a2   : > { %1550 = vmatpush.msra.mxu2 %v3358_v21 }
 0x1a3   : > { %1721 = vmatpush.msra.mxu1 %v3396_v31 }
 0x1a4   : > { %1551 = vmatpush.msra.mxu2 %v3362_v22 }
 0x1a6   : > { %1552 = vmatpush.msra.mxu2 %v3366_v24 }
 0x1a8   : > { %1553 = vmatpush.msra.mxu2 %v3374_v26 }
 0x1aa   : > { %1554 = vmatpush.msra.mxu2 %v3382_v28 }
 0x1ac   : > { %1555 = vmatpush.msra.mxu2 %v3390_v30 }
 0x1ae   : > { %1556 = vmatpush.msra.mxu2 %v3398_v32 }
 0x1b0   : > { %1557 = vmatpush.msra.mxu2 %v3404_v33 }
 0x1b2   : > { %1734 = vmatpush.msrb.mxu2 %v3358_v21 }
 0x1b4   : > { %1735 = vmatpush.msrb.mxu2 %v3362_v22 }
 0x1b6   : > { %1736 = vmatpush.msrb.mxu2 %v3366_v24 }
 0x1b8   : > { %1737 = vmatpush.msrb.mxu2 %v3374_v26 }
 0x1ba   : > { %1738 = vmatpush.msrb.mxu2 %v3382_v28 }
 0x1bc   : > { %1739 = vmatpush.msrb.mxu2 %v3390_v30 }
 0x1be   : > { %1740 = vmatpush.msrb.mxu2 %v3398_v32 }
 0x1c0   : > { %1741 = vmatpush.msrb.mxu2 %v3404_v33 }
 0x214   : > { %v1060_v43 = vpop.f32.mrf.mxu2 }
 0x215   : > { %v1083_v44 = vpop.f32.mrf.mxu3 }
 0x216   : > { %v1084_v45 = vadd.f32 %v1083_v44, %v1060_v43  ;;  %v1319_v43 = vld [vmem:[#allocation21] sm:$0x3] }
 0x217   : > { %v1324_v44 = vsub.f32 1.0, %v1319_v43 }
 0x21c   : > { %v1114_v47 = vpop.f32.mrf.mxu2 }
 0x21d   : > { %v1117_v48 = vadd.f32 %v1114_v47, %v1084_v45  ;;  %v3467_v45 = vperm.slane %v1318_v42, 0 }
 0x21f   : > { %v1122_v50 = vmul.f32 %v2531_v46, %v1117_v48  ;;  %v1352_v46 = vpop.f32.mrf.mxu1 }
 0x221   : > { %v1127_v51 = vadd.f32 %v2532_v49, %v1122_v50 }
 0x223   : > { %v1128_v52 = vmax.f32 %v1127_v51, 0.0  ;;  %v1353_v51 = vadd.f32 %v1352_v46, %v3467_v45 }
 0x225   : > { %1130 = vrot.lane.b32.xlu2 %v1128_v52, %s2990_s22  ;;  %s3772_s22 = sld [smem:[#allocation37_spill]] }
 0x22b   : > { %v2533_v10 = vld [vmem:[%s3772_s22] ss:$0 sm:$0xff] }
 0x27f   : > { %v1131_v62 = vpop.permute.xlu2 %1130 }
 0x280   : > { %v1133_v63 = vmax.f32 %v1128_v52, %v1131_v62 }
 0x282   : > { %1138 = vst.msk [vmem:[#allocation4 + $0x1] sm:$0xff] %vm1134_vm6, %v1133_v63 }
 0x289   : > { %v1143_v1 = vld [vmem:[#allocation4 + $0x1] sm:$0xff] }
 0x28a   : > { %v1139_v2 = vld [vmem:[#allocation4] sm:$0xff]  ;;  %2344 = vmatmul.msk.f32.vlgmr.msra.gmra.mxu3 %vm1134_vm6, %v1143_v1 }
 0x28b   : > { %2345 = vmatmul.msk.f32.vlgmr.msra.gmra.mxu0 %vm1134_vm6, %v1139_v2  ;;  %v1194_v3 = vld [vmem:[#allocation4 + $0x2] sm:$0xff]  ;;  %2350 = vmatpush.msk.msra.mxu3 %vm815_vm2, %v1241_v4 }
 0x28c   : > { %1457 = vmatpush.msra.mxu0 %v3358_v21 }
 0x28d   : > { %1274 = vmatpush.msra.mxu3 %v1239_v5 }
 0x28e   : > { %1458 = vmatpush.msra.mxu0 %v3362_v22 }
 0x290   : > { %1459 = vmatpush.msra.mxu0 %v3366_v24 }
 0x292   : > { %2349 = vmatmul.msk.f32.vlgmr.msrb.gmra.mxu3 %vm1134_vm6, %v1194_v3  ;;  %1460 = vmatpush.msra.mxu0 %v3374_v26 }
 0x293   : > { %1437 = vmatpush.msrb.mxu3 %v3350_v18 }
 0x294   : > { %1461 = vmatpush.msra.mxu0 %v3382_v28 }
 0x295   : > { %1438 = vmatpush.msrb.mxu3 %v3352_v19 }
 0x296   : > { %1462 = vmatpush.msra.mxu0 %v3390_v30 }
 0x297   : > { %1439 = vmatpush.msrb.mxu3 %v3356_v20 }
 0x298   : > { %1463 = vmatpush.msra.mxu0 %v3398_v32 }
 0x299   : > { %1440 = vmatpush.msrb.mxu3 %v3364_v23 }
 0x29a   : > { %1464 = vmatpush.msra.mxu0 %v3404_v33 }
 0x29b   : > { %1441 = vmatpush.msrb.mxu3 %v3372_v25 }
 0x29d   : > { %1442 = vmatpush.msrb.mxu3 %v3380_v27 }
 0x29f   : > { %1443 = vmatpush.msrb.mxu3 %v3388_v29 }
 0x2a1   : > { %1444 = vmatpush.msrb.mxu3 %v3396_v31 }
 0x308   : > { %v1191_v8 = vpop.f32.mrf.mxu0 }
 0x30d   : > { %v1168_v7 = vpop.f32.mrf.mxu3 }
 0x30e   : > { %v1192_v9 = vadd.f32 %v1191_v8, %v1168_v7 }
 0x315   : > { %v1219_v11 = vpop.f32.mrf.mxu3 }
 0x316   : > { %v1222_v12 = vadd.f32 %v1219_v11, %v1192_v9 }
 0x318   : > { %v1227_v14 = vmul.f32 %v2533_v10, %v1222_v12 }
 0x31a   : > { %v3342_v15 = vadd.f32 %v2534_v13, %v1227_v14 }
 0x31c   : > { %v1233_v16 = vmax.f32 %v3342_v15, 0.0 }
 0x31e   : > { %1235 = vrot.lane.b32.xlu0 %v1233_v16, %s2991_s29 }
 0x390   : > { %v1236_v0 = vpop.permute.xlu0 %1235 }
 0x391   : > { %v1238_v34 = vmax.f32 %v1233_v16, %v1236_v0 }
 0x393   : > { %2351 = vmatmul.msk.f32.vlgmr.msra.gmra.mxu3 %vm1249_vm8, %v1238_v34  ;;  %2353 = vmatmul.msk.f32.vlgmr.msrb.gmra.mxu0 %vm1249_vm8, %v1238_v34 }
 0x394   : > { %1623 = vmatpush.msra.mxu3 %v3350_v18  ;;  %1643 = vmatpush.msrb.mxu0 %v3358_v21 }
 0x396   : > { %1624 = vmatpush.msra.mxu3 %v3352_v19  ;;  %1644 = vmatpush.msrb.mxu0 %v3362_v22 }
 0x398   : > { %1625 = vmatpush.msra.mxu3 %v3356_v20  ;;  %1645 = vmatpush.msrb.mxu0 %v3366_v24 }
 0x39a   : > { %1626 = vmatpush.msra.mxu3 %v3364_v23  ;;  %1646 = vmatpush.msrb.mxu0 %v3374_v26 }
 0x39c   : > { %1627 = vmatpush.msra.mxu3 %v3372_v25  ;;  %1647 = vmatpush.msrb.mxu0 %v3382_v28 }
 0x39e   : > { %1628 = vmatpush.msra.mxu3 %v3380_v27  ;;  %1648 = vmatpush.msrb.mxu0 %v3390_v30 }
 0x3a0   : > { %1629 = vmatpush.msra.mxu3 %v3388_v29  ;;  %1649 = vmatpush.msrb.mxu0 %v3398_v32 }
 0x3a2   : > { %1630 = vmatpush.msra.mxu3 %v3396_v31  ;;  %1650 = vmatpush.msrb.mxu0 %v3404_v33 }
 0x410   : > { %v1296_v37 = vpop.f32.mrf.mxu0 }
 0x411   : > { %v1297_v38 = vadd.f32 %v1296_v37, %v1246_v36 }
 0x413   : > { %1301 = vst.msk [vmem:[#allocation5 + $0x8] sm:$0xff] %vm1300_vm9, %v1297_v38 }
 0x416   : > { %v1276_v40 = vpop.f32.mrf.mxu3 }
 0x417   : > { %v1277_v41 = vadd.f32 %v1276_v40, %v1245_v39 }
 0x419   : > { %1299 = vst [vmem:[#allocation5] sm:$0xff] %v1277_v41 }
 0x420   : > { %v1320_v47 = vld [vmem:[#allocation5] ss:$8 sm:$0x3]  ;;  %v1322_v48 = vld [vmem:[#allocation5 + $0x7] ss:$8 sm:$0x3] }
 0x421   : > { %v1323_v49 = vmul.f32 %v1320_v47, %v1319_v43  ;;  %v1325_v50 = vmul.f32 %v1324_v44, %v1322_v48  ;;  %v1421_v52 = vld [vmem:[#allocation5 + $0x1] ss:$8 sm:$0x3]  ;;  %v1423_v53 = vld [vmem:[#allocation5 + $0x6] ss:$8 sm:$0x3] }
 0x422   : > { %v1424_v54 = vmul.f32 %v1421_v52, %v1319_v43  ;;  %v1425_v55 = vmul.f32 %v1423_v53, %v1324_v44  ;;  %v1514_v56 = vld [vmem:[#allocation5 + $0x2] ss:$8 sm:$0x3]  ;;  %v1516_v57 = vld [vmem:[#allocation5 + $0x5] ss:$8 sm:$0x3]  ;;  %v1372_v52 = vpop.f32.mrf.mxu2 }
 0x423   : > { %v1326_v58 = vadd.f32 %v1325_v50, %v1323_v49  ;;  %v1517_v59 = vmul.f32 %v1514_v56, %v1319_v43  ;;  %v1518_v60 = vmul.f32 %v1516_v57, %v1324_v44  ;;  %v1607_v61 = vld [vmem:[#allocation5 + $0x3] ss:$8 sm:$0x3]  ;;  %v1609_v62 = vld [vmem:[#allocation5 + $0x4] ss:$8 sm:$0x3] }
 0x424   : > { %v3470_v63 = vadd.f32 %v1425_v55, %v1424_v54  ;;  %v1610_v1 = vmul.f32 %v1607_v61, %v1319_v43  ;;  %v1611_v2 = vmul.f32 %v1609_v62, %v1324_v44  ;;  %v1699_v3 = vld [vmem:[#allocation5 + $0x4] ss:$8 sm:$0x3]  ;;  %v1700_v4 = vld [vmem:[#allocation5 + $0x3] ss:$8 sm:$0x3] }
 0x425   : > { %v1375_v5 = vadd.f32 %v1353_v51, %v1326_v58  ;;  %v3472_v6 = vadd.f32 %v1518_v60, %v1517_v59  ;;  %v1701_v7 = vmul.f32 %v1699_v3, %v1319_v43  ;;  %v1790_v8 = vld [vmem:[#allocation5 + $0x5] ss:$8 sm:$0x3]  ;;  %v1702_v10 = vmul.f32 %v1700_v4, %v1324_v44  ;;  %v1791_v11 = vld [vmem:[#allocation5 + $0x2] ss:$8 sm:$0x3] }
 0x426   : > { %v3474_v9 = vadd.f32 %v1611_v2, %v1610_v1  ;;  %v1792_v12 = vmul.f32 %v1790_v8, %v1319_v43  ;;  %v1793_v14 = vmul.f32 %v1791_v11, %v1324_v44  ;;  %v1881_v15 = vld [vmem:[#allocation5 + $0x6] ss:$8 sm:$0x3]  ;;  %v1882_v17 = vld [vmem:[#allocation5 + $0x1] ss:$8 sm:$0x3] }
 0x427   : > { %v2354_v13 = vmul.f32 -1.442695, %v1375_v5  ;;  %v3476_v16 = vadd.f32 %v1702_v10, %v1701_v7  ;;  %v1883_v0 = vmul.f32 %v1881_v15, %v1319_v43  ;;  %v1884_v35 = vmul.f32 %v1882_v17, %v1324_v44  ;;  %v1972_v36 = vld [vmem:[#allocation5 + $0x7] ss:$8 sm:$0x3] }
 0x428   : > { %v3478_v34 = vadd.f32 %v1793_v14, %v1792_v12  ;;  %v1973_v37 = vld [vmem:[#allocation5] ss:$8 sm:$0x3]  ;;  %v1974_v38 = vmul.f32 %v1972_v36, %v1319_v43  ;;  %v3484_v50 = vperm.slane %v1318_v42, 1  ;;  %v1397_v61 = vrot.slane %v1326_v58, 1 }
 0x429   : > { %2537 = vpow2.f32 %v2354_v13  ;;  %v1975_v39 = vmul.f32 %v1973_v37, %v1324_v44  ;;  %v3480_v40 = vadd.f32 %v1884_v35, %v1883_v0 }
 0x42a   : > { %v1373_v43 = vadd.f32 %v1372_v52, %v3484_v50  ;;  %v1491_v52 = vrot.slane %v3470_v63, 1 }
 0x42b   : > { %v3482_v41 = vadd.f32 %v1975_v39, %v1974_v38 }
 0x42f   : > { %v2538_v46 = vpop.eup %2537 }
 0x430   : > { %v1379_v47 = vadd.f32 1.0, %v2538_v46 }
 0x432   : > { %2539 = vrcp.f32 %v1379_v47  ;;  %v1391_v53 = vand.u32 2147483648, %v1379_v47  ;;  %v1389_v55 = vand.u32 2147483647, %v1379_v47  ;;  %vm1385_vm11 = vweird.f32 %v1379_v47 }
 0x434   : > { %v1392_v56 = vor.u32 1.1754944e-38, %v1391_v53  ;;  %vm1390_vm13 = vcmp.eq.f32.partialorder %v1389_v55, 8.507059e+37 }
 0x438   : > { %v2540_v48 = vpop.eup %2539 }
 0x439   : > { %v1381_v49 = vmul.f32 %v2540_v48, %v1379_v47  ;;  %vm1386_vm10 = vweird.f32 %v2540_v48 }
 0x43a   : > { %vm1387_vm12 = vmor %vm1385_vm11, %vm1386_vm10 }
 0x43b   : > { %v1382_v51 = vsub.f32 1.0, %v1381_v49 }
 0x43d   : > { %v1383_v54 = vmul.f32 %v2540_v48, %v1382_v51 }
 0x43f   : > { %v1384_v44 = vadd.f32 %v2540_v48, %v1383_v54 }
 0x441   : > { %v1388_v57 = vsel %vm1387_vm12, %v2540_v48, %v1384_v44 }
 0x442   : > { %v1393_v59 = vsel %vm1390_vm13, %v1392_v56, %v1388_v57 }
 0x443   : > { %v1395_v60 = vmul.f32 %v1393_v59, %v1373_v43  ;;  %v1401_v1 = vsub.f32 1.0, %v1393_v59  ;;  %v1407_v3 = vmul.f32 0.0, %v1393_v59 }
 0x445   : > { %v1399_v62 = vadd.f32 %v1397_v61, %v1395_v60 }
 0x447   : > { %2541 = vtanh.f32 %v1399_v62 }
 0x44d   : > { %v2542_v42 = vpop.eup %2541 }
 0x44e   : > { %1403 = vrot.lane.b32.xlu1 %v2542_v42, %s2987_s21 }
 0x4c0   : > { %v1404_v2 = vpop.permute.xlu1 %1403 }
 0x4c1   : > { %v1406_v4 = vmul.f32 %v1404_v2, %v1401_v1 }
 0x4c3   : > { %v3488_v5 = vadd.f32 %v1407_v3, %v1406_v4 }
 0x4c5   : > { %v1410_v7 = vperm.slane %v3488_v5, 0 }
 0x4c7   : > { %1411 = vrot.lane.b32.xlu2 %v1410_v7, %s2987_s21 }
 0x521   : > { %v1412_v8 = vpop.permute.xlu2 %1411 }
 0x522   : > { %1415 = vst.msk [vmem:[#allocation6] sm:$0x1] %vm1414_vm14, %v1412_v8  ;;  %2355 = vmatmul.msk.f32.vlgmr.msrb.gmra.mxu3 %vm1300_vm9, %v1412_v8  ;;  %2356 = vmatmul.msk.f32.vlgmr.msra.gmra.mxu0 %vm1300_vm9, %v1412_v8 }
 0x523   : > { %1805 = vmatpush.msrb.mxu3 %v3350_v18  ;;  %1825 = vmatpush.msra.mxu0 %v3358_v21 }
 0x525   : > { %1806 = vmatpush.msrb.mxu3 %v3352_v19  ;;  %1826 = vmatpush.msra.mxu0 %v3362_v22 }
 0x527   : > { %1807 = vmatpush.msrb.mxu3 %v3356_v20  ;;  %1827 = vmatpush.msra.mxu0 %v3366_v24 }
 0x529   : > { %1808 = vmatpush.msrb.mxu3 %v3364_v23  ;;  %1828 = vmatpush.msra.mxu0 %v3374_v26 }
 0x52b   : > { %1809 = vmatpush.msrb.mxu3 %v3372_v25  ;;  %1829 = vmatpush.msra.mxu0 %v3382_v28 }
 0x52d   : > { %1810 = vmatpush.msrb.mxu3 %v3380_v27  ;;  %1830 = vmatpush.msra.mxu0 %v3390_v30 }
 0x52f   : > { %1811 = vmatpush.msrb.mxu3 %v3388_v29  ;;  %1831 = vmatpush.msra.mxu0 %v3398_v32 }
 0x531   : > { %1812 = vmatpush.msrb.mxu3 %v3396_v31  ;;  %1832 = vmatpush.msra.mxu0 %v3404_v33 }
 0x59f   : > { %v1466_v38 = vpop.f32.mrf.mxu0 }
 0x5a0   : > { %v1467_v47 = vadd.f32 %v1466_v38, %v3484_v50 }
 0x5a5   : > { %v1446_v58 = vpop.f32.mrf.mxu3 }
 0x5a6   : > { %v1447_v10 = vadd.f32 %v1446_v58, %v3467_v45 }
 0x5a8   : > { %v1469_v11 = vadd.f32 %v1447_v10, %v3470_v63 }
 0x5aa   : > { %v2357_v12 = vmul.f32 -1.442695, %v1469_v11 }
 0x5ac   : > { %2543 = vpow2.f32 %v2357_v12 }
 0x5b2   : > { %v2544_v13 = vpop.eup %2543 }
 0x5b3   : > { %v1473_v14 = vadd.f32 1.0, %v2544_v13 }
 0x5b5   : > { %2545 = vrcp.f32 %v1473_v14  ;;  %v1485_v35 = vand.u32 2147483648, %v1473_v14  ;;  %v1483_v37 = vand.u32 2147483647, %v1473_v14  ;;  %vm1479_vm0 = vweird.f32 %v1473_v14 }
 0x5b7   : > { %v1486_v46 = vor.u32 1.1754944e-38, %v1485_v35  ;;  %vm1484_vm2 = vcmp.eq.f32.partialorder %v1483_v37, 8.507059e+37 }
 0x5bb   : > { %v2546_v15 = vpop.eup %2545 }
 0x5bc   : > { %v1475_v17 = vmul.f32 %v2546_v15, %v1473_v14  ;;  %vm1480_vm15 = vweird.f32 %v2546_v15 }
 0x5bd   : > { %vm1481_vm1 = vmor %vm1479_vm0, %vm1480_vm15 }
 0x5be   : > { %v1476_v0 = vsub.f32 1.0, %v1475_v17 }
 0x5c0   : > { %v1477_v36 = vmul.f32 %v2546_v15, %v1476_v0 }
 0x5c2   : > { %v1478_v39 = vadd.f32 %v2546_v15, %v1477_v36  ;;  %v1584_v36 = vrot.slane %v3472_v6, 1 }
 0x5c4   : > { %v1482_v48 = vsel %vm1481_vm1, %v2546_v15, %v1478_v39 }
 0x5c5   : > { %v1487_v49 = vsel %vm1484_vm2, %v1486_v46, %v1482_v48 }
 0x5c6   : > { %v1489_v51 = vmul.f32 %v1487_v49, %v1467_v47  ;;  %v1495_v55 = vsub.f32 1.0, %v1487_v49  ;;  %v1501_v44 = vmul.f32 %v1487_v49, %v3488_v5 }
 0x5c8   : > { %v1493_v53 = vadd.f32 %v1491_v52, %v1489_v51 }
 0x5ca   : > { %2547 = vtanh.f32 %v1493_v53 }
 0x5d0   : > { %v2548_v54 = vpop.eup %2547 }
 0x5d1   : > { %1497 = vrot.lane.b32.xlu0 %v2548_v54, %s2987_s21 }
 0x643   : > { %v1498_v43 = vpop.permute.xlu0 %1497 }
 0x644   : > { %v1500_v56 = vmul.f32 %v1498_v43, %v1495_v55  ;;  %v1677_v55 = vrot.slane %v3474_v9, 1 }
 0x646   : > { %v3519_v57 = vadd.f32 %v1501_v44, %v1500_v56 }
 0x648   : > { %v1504_v59 = vperm.slane %v3519_v57, 0 }
 0x64a   : > { %1505 = vrot.lane.b32.xlu1 %v1504_v59, %s2987_s21 }
 0x6bc   : > { %v1506_v60 = vpop.permute.xlu1 %1505 }
 0x6bd   : > { %1508 = vst.msk [vmem:[#allocation6 + $0x1] sm:$0x1] %vm1414_vm14, %v1506_v60  ;;  %2358 = vmatmul.msk.f32.vlgmr.msrb.gmra.mxu1 %vm1300_vm9, %v1506_v60  ;;  %2359 = vmatmul.msk.f32.vlgmr.msra.gmra.mxu2 %vm1300_vm9, %v1506_v60 }
 0x6be   : > { %1896 = vmatpush.msrb.mxu1 %v3350_v18  ;;  %1916 = vmatpush.msra.mxu2 %v3358_v21 }
 0x6c0   : > { %1897 = vmatpush.msrb.mxu1 %v3352_v19  ;;  %1917 = vmatpush.msra.mxu2 %v3362_v22 }
 0x6c2   : > { %1898 = vmatpush.msrb.mxu1 %v3356_v20  ;;  %1918 = vmatpush.msra.mxu2 %v3366_v24 }
 0x6c4   : > { %1899 = vmatpush.msrb.mxu1 %v3364_v23  ;;  %1919 = vmatpush.msra.mxu2 %v3374_v26 }
 0x6c6   : > { %1900 = vmatpush.msrb.mxu1 %v3372_v25  ;;  %1920 = vmatpush.msra.mxu2 %v3382_v28 }
 0x6c8   : > { %1901 = vmatpush.msrb.mxu1 %v3380_v27  ;;  %1921 = vmatpush.msra.mxu2 %v3390_v30 }
 0x6ca   : > { %1902 = vmatpush.msrb.mxu1 %v3388_v29  ;;  %1922 = vmatpush.msra.mxu2 %v3398_v32 }
 0x6cc   : > { %1903 = vmatpush.msrb.mxu1 %v3396_v31  ;;  %1923 = vmatpush.msra.mxu2 %v3404_v33 }
 0x73a   : > { %v1539_v63 = vpop.f32.mrf.mxu1 }
 0x73b   : > { %v1540_v61 = vadd.f32 %v1539_v63, %v3467_v45 }
 0x73d   : > { %v1562_v62 = vadd.f32 %v1540_v61, %v3472_v6 }
 0x73f   : > { %v2360_v42 = vmul.f32 -1.442695, %v1562_v62 }
 0x740   : > { %v1559_v12 = vpop.f32.mrf.mxu2 }
 0x741   : > { %2549 = vpow2.f32 %v2360_v42  ;;  %v1560_v15 = vadd.f32 %v1559_v12, %v3484_v50 }
 0x747   : > { %v2550_v1 = vpop.eup %2549 }
 0x748   : > { %v1566_v2 = vadd.f32 1.0, %v2550_v1 }
 0x74a   : > { %2551 = vrcp.f32 %v1566_v2  ;;  %v1578_v58 = vand.u32 2147483648, %v1566_v2  ;;  %v1576_v11 = vand.u32 2147483647, %v1566_v2  ;;  %vm1572_vm4 = vweird.f32 %v1566_v2 }
 0x74c   : > { %v1579_v14 = vor.u32 1.1754944e-38, %v1578_v58  ;;  %vm1577_vm7 = vcmp.eq.f32.partialorder %v1576_v11, 8.507059e+37 }
 0x750   : > { %v2552_v3 = vpop.eup %2551 }
 0x751   : > { %v1568_v4 = vmul.f32 %v2552_v3, %v1566_v2  ;;  %vm1573_vm3 = vweird.f32 %v2552_v3 }
 0x752   : > { %vm1574_vm6 = vmor %vm1572_vm4, %vm1573_vm3 }
 0x753   : > { %v1569_v8 = vsub.f32 1.0, %v1568_v4 }
 0x755   : > { %v1570_v10 = vmul.f32 %v2552_v3, %v1569_v8 }
 0x757   : > { %v1571_v13 = vadd.f32 %v2552_v3, %v1570_v10 }
 0x759   : > { %v1575_v17 = vsel %vm1574_vm6, %v2552_v3, %v1571_v13 }
 0x75a   : > { %v1580_v0 = vsel %vm1577_vm7, %v1579_v14, %v1575_v17 }
 0x75b   : > { %v1582_v35 = vmul.f32 %v1580_v0, %v1560_v15  ;;  %v1588_v39 = vsub.f32 1.0, %v1580_v0  ;;  %v1594_v47 = vmul.f32 %v1580_v0, %v3519_v57 }
 0x75d   : > { %v1586_v37 = vadd.f32 %v1584_v36, %v1582_v35 }
 0x75f   : > { %2553 = vtanh.f32 %v1586_v37 }
 0x765   : > { %v2554_v38 = vpop.eup %2553 }
 0x766   : > { %1590 = vrot.lane.b32.xlu2 %v2554_v38, %s2987_s21 }
 0x7c0   : > { %v1591_v46 = vpop.permute.xlu2 %1590 }
 0x7c1   : > { %v1593_v48 = vmul.f32 %v1591_v46, %v1588_v39  ;;  %v1768_v46 = vrot.slane %v3476_v16, 1 }
 0x7c3   : > { %v3550_v49 = vadd.f32 %v1594_v47, %v1593_v48 }
 0x7c5   : > { %v1597_v51 = vperm.slane %v3550_v49, 0 }
 0x7c7   : > { %1598 = vrot.lane.b32.xlu0 %v1597_v51, %s2987_s21 }
 0x839   : > { %v1599_v52 = vpop.permute.xlu0 %1598 }
 0x83a   : > { %1601 = vst.msk [vmem:[#allocation6 + $0x2] sm:$0x1] %vm1414_vm14, %v1599_v52  ;;  %2361 = vmatmul.msk.f32.vlgmr.msra.gmra.mxu3 %vm1300_vm9, %v1599_v52  ;;  %2362 = vmatmul.msk.f32.vlgmr.msrb.gmra.mxu0 %vm1300_vm9, %v1599_v52 }
 0x83b   : > { %1987 = vmatpush.msra.mxu3 %v3350_v18  ;;  %2007 = vmatpush.msrb.mxu0 %v3358_v21 }
 0x83d   : > { %1988 = vmatpush.msra.mxu3 %v3352_v19  ;;  %2008 = vmatpush.msrb.mxu0 %v3362_v22 }
 0x83f   : > { %1989 = vmatpush.msra.mxu3 %v3356_v20  ;;  %2009 = vmatpush.msrb.mxu0 %v3366_v24 }
 0x841   : > { %1990 = vmatpush.msra.mxu3 %v3364_v23  ;;  %2010 = vmatpush.msrb.mxu0 %v3374_v26 }
 0x843   : > { %1991 = vmatpush.msra.mxu3 %v3372_v25  ;;  %2011 = vmatpush.msrb.mxu0 %v3382_v28 }
 0x845   : > { %1992 = vmatpush.msra.mxu3 %v3380_v27  ;;  %2012 = vmatpush.msrb.mxu0 %v3390_v30 }
 0x847   : > { %1993 = vmatpush.msra.mxu3 %v3388_v29  ;;  %2013 = vmatpush.msrb.mxu0 %v3398_v32 }
 0x849   : > { %1994 = vmatpush.msra.mxu3 %v3396_v31  ;;  %2014 = vmatpush.msrb.mxu0 %v3404_v33 }
 0x8b7   : > { %v1652_v30 = vpop.f32.mrf.mxu0 }
 0x8b8   : > { %v1653_v33 = vadd.f32 %v1652_v30, %v3484_v50 }
 0x8bd   : > { %v1632_v18 = vpop.f32.mrf.mxu3 }
 0x8be   : > { %v1633_v19 = vadd.f32 %v1632_v18, %v3467_v45 }
 0x8c0   : > { %v1655_v20 = vadd.f32 %v1633_v19, %v3474_v9 }
 0x8c2   : > { %v2363_v21 = vmul.f32 -1.442695, %v1655_v20 }
 0x8c4   : > { %2555 = vpow2.f32 %v2363_v21 }
 0x8ca   : > { %v2556_v22 = vpop.eup %2555 }
 0x8cb   : > { %v1659_v23 = vadd.f32 1.0, %v2556_v22 }
 0x8cd   : > { %2557 = vrcp.f32 %v1659_v23  ;;  %v1671_v27 = vand.u32 2147483648, %v1659_v23  ;;  %v1669_v29 = vand.u32 2147483647, %v1659_v23  ;;  %vm1665_vm10 = vweird.f32 %v1659_v23 }
 0x8cf   : > { %v1672_v32 = vor.u32 1.1754944e-38, %v1671_v27  ;;  %vm1670_vm12 = vcmp.eq.f32.partialorder %v1669_v29, 8.507059e+37 }
 0x8d3   : > { %v2558_v24 = vpop.eup %2557 }
 0x8d4   : > { %v1661_v25 = vmul.f32 %v2558_v24, %v1659_v23  ;;  %vm1666_vm8 = vweird.f32 %v2558_v24 }
 0x8d5   : > { %vm1667_vm11 = vmor %vm1665_vm10, %vm1666_vm8 }
 0x8d6   : > { %v1662_v26 = vsub.f32 1.0, %v1661_v25 }
 0x8d8   : > { %v1663_v28 = vmul.f32 %v2558_v24, %v1662_v26 }
 0x8da   : > { %v1664_v31 = vadd.f32 %v2558_v24, %v1663_v28 }
 0x8dc   : > { %v1668_v6 = vsel %vm1667_vm11, %v2558_v24, %v1664_v31 }
 0x8dd   : > { %v1673_v53 = vsel %vm1670_vm12, %v1672_v32, %v1668_v6 }
 0x8de   : > { %v1675_v54 = vmul.f32 %v1673_v53, %v1653_v33  ;;  %v1681_v56 = vsub.f32 1.0, %v1673_v53  ;;  %v1687_v63 = vmul.f32 %v1673_v53, %v3550_v49  ;;  %v2077_v49 = vld [vmem:[%s3773_s11 + $0x38] sm:$0xff] }
 0x8e0   : > { %v1679_v43 = vadd.f32 %v1677_v55, %v1675_v54 }
 0x8e2   : > { %2559 = vtanh.f32 %v1679_v43 }
 0x8e8   : > { %v2560_v44 = vpop.eup %2559 }
 0x8e9   : > { %1683 = vrot.lane.b32.xlu1 %v2560_v44, %s2987_s21 }
 0x95b   : > { %v1684_v60 = vpop.permute.xlu1 %1683 }
 0x95c   : > { %v1686_v61 = vmul.f32 %v1684_v60, %v1681_v56 }
 0x95e   : > { %v3581_v62 = vadd.f32 %v1687_v63, %v1686_v61  ;;  %v1859_v63 = vrot.slane %v3478_v34, 1 }
 0x960   : > { %v1690_v42 = vperm.slane %v3581_v62, 0 }
 0x962   : > { %1691 = vrot.lane.b32.xlu2 %v1690_v42, %s2987_s21 }
 0x9bc   : > { %v1692_v1 = vpop.permute.xlu2 %1691 }
 0x9bd   : > { %1694 = vst.msk [vmem:[#allocation6 + $0x3] sm:$0x1] %vm1414_vm14, %v1692_v1  ;;  %2364 = vmatmul.msk.f32.vlgmr.msra.gmra.mxu1 %vm1300_vm9, %v1692_v1  ;;  %2365 = vmatmul.msk.f32.vlgmr.msrb.gmra.mxu2 %vm1300_vm9, %v1692_v1 }
 0x9be   : > { %2093 = vmatpush.msra.mxu1 %v2077_v49 }
 0xa3a   : > { %v1723_v9 = vpop.f32.mrf.mxu1 }
 0xa3b   : > { %v1724_v2 = vadd.f32 %v1723_v9, %v3467_v45 }
 0xa3d   : > { %v1746_v3 = vadd.f32 %v1724_v2, %v3476_v16 }
 0xa3f   : > { %v2366_v4 = vmul.f32 -1.442695, %v1746_v3 }
 0xa40   : > { %v1743_v17 = vpop.f32.mrf.mxu2 }
 0xa41   : > { %2561 = vpow2.f32 %v2366_v4  ;;  %v1744_v36 = vadd.f32 %v1743_v17, %v3484_v50 }
 0xa47   : > { %v2562_v8 = vpop.eup %2561 }
 0xa48   : > { %v1750_v58 = vadd.f32 1.0, %v2562_v8 }
 0xa4a   : > { %2563 = vrcp.f32 %v1750_v58  ;;  %v1762_v13 = vand.u32 2147483648, %v1750_v58  ;;  %v1760_v15 = vand.u32 2147483647, %v1750_v58  ;;  %vm1756_vm15 = vweird.f32 %v1750_v58 }
 0xa4c   : > { %v1763_v35 = vor.u32 1.1754944e-38, %v1762_v13  ;;  %vm1761_vm1 = vcmp.eq.f32.partialorder %v1760_v15, 8.507059e+37 }
 0xa50   : > { %v2564_v10 = vpop.eup %2563 }
 0xa51   : > { %v1752_v11 = vmul.f32 %v2564_v10, %v1750_v58  ;;  %vm1757_vm13 = vweird.f32 %v2564_v10 }
 0xa52   : > { %vm1758_vm0 = vmor %vm1756_vm15, %vm1757_vm13 }
 0xa53   : > { %v1753_v12 = vsub.f32 1.0, %v1752_v11 }
 0xa55   : > { %v1754_v14 = vmul.f32 %v2564_v10, %v1753_v12 }
 0xa57   : > { %v1755_v0 = vadd.f32 %v2564_v10, %v1754_v14 }
 0xa59   : > { %v1759_v37 = vsel %vm1758_vm0, %v2564_v10, %v1755_v0 }
 0xa5a   : > { %v1764_v38 = vsel %vm1761_vm1, %v1763_v35, %v1759_v37 }
 0xa5b   : > { %v1766_v39 = vmul.f32 %v1764_v38, %v1744_v36  ;;  %v1772_v52 = vsub.f32 1.0, %v1764_v38  ;;  %v1778_v19 = vmul.f32 %v1764_v38, %v3581_v62 }
 0xa5d   : > { %v1770_v47 = vadd.f32 %v1768_v46, %v1766_v39 }
 0xa5f   : > { %2565 = vtanh.f32 %v1770_v47 }
 0xa65   : > { %v2566_v48 = vpop.eup %2565 }
 0xa66   : > { %1774 = vrot.lane.b32.xlu0 %v2566_v48, %s2987_s21 }
 0xad8   : > { %v1775_v18 = vpop.permute.xlu0 %1774 }
 0xad9   : > { %v1777_v20 = vmul.f32 %v1775_v18, %v1772_v52 }
 0xadb   : > { %v3596_v21 = vadd.f32 %v1778_v19, %v1777_v20  ;;  %v1950_v20 = vrot.slane %v3480_v40, 1 }
 0xadd   : > { %v1781_v22 = vperm.slane %v3596_v21, 0 }
 0xadf   : > { %1782 = vrot.lane.b32.xlu1 %v1781_v22, %s2987_s21 }
 0xb51   : > { %v1783_v23 = vpop.permute.xlu1 %1782 }
 0xb52   : > { %1785 = vst.msk [vmem:[#allocation6 + $0x4] sm:$0x1] %vm1414_vm14, %v1783_v23  ;;  %2367 = vmatmul.msk.f32.vlgmr.msrb.gmra.mxu3 %vm1300_vm9, %v1783_v23  ;;  %2368 = vmatmul.msk.f32.vlgmr.msra.gmra.mxu0 %vm1300_vm9, %v1783_v23 }
 0xbcf   : > { %v1834_v53 = vpop.f32.mrf.mxu0 }
 0xbd0   : > { %v1835_v43 = vadd.f32 %v1834_v53, %v3484_v50 }
 0xbd5   : > { %v1814_v16 = vpop.f32.mrf.mxu3 }
 0xbd6   : > { %v1815_v24 = vadd.f32 %v1814_v16, %v3467_v45 }
 0xbd8   : > { %v1837_v25 = vadd.f32 %v1815_v24, %v3478_v34 }
 0xbda   : > { %v2369_v26 = vmul.f32 -1.442695, %v1837_v25 }
 0xbdc   : > { %2567 = vpow2.f32 %v2369_v26 }
 0xbe2   : > { %v2568_v27 = vpop.eup %2567 }
 0xbe3   : > { %v1841_v28 = vadd.f32 1.0, %v2568_v27 }
 0xbe5   : > { %2569 = vrcp.f32 %v1841_v28  ;;  %v1853_v32 = vand.u32 2147483648, %v1841_v28  ;;  %v1851_v6 = vand.u32 2147483647, %v1841_v28  ;;  %vm1847_vm3 = vweird.f32 %v1841_v28 }
 0xbe7   : > { %v1854_v55 = vor.u32 1.1754944e-38, %v1853_v32  ;;  %vm1852_vm6 = vcmp.eq.f32.partialorder %v1851_v6, 8.507059e+37 }
 0xbeb   : > { %v2570_v29 = vpop.eup %2569 }
 0xbec   : > { %v1843_v30 = vmul.f32 %v2570_v29, %v1841_v28  ;;  %vm1848_vm2 = vweird.f32 %v2570_v29 }
 0xbed   : > { %vm1849_vm4 = vmor %vm1847_vm3, %vm1848_vm2 }
 0xbee   : > { %v1844_v31 = vsub.f32 1.0, %v1843_v30 }
 0xbf0   : > { %v1845_v33 = vmul.f32 %v2570_v29, %v1844_v31 }
 0xbf2   : > { %v1846_v54 = vadd.f32 %v2570_v29, %v1845_v33 }
 0xbf4   : > { %v1850_v44 = vsel %vm1849_vm4, %v2570_v29, %v1846_v54 }
 0xbf5   : > { %v1855_v56 = vsel %vm1852_vm6, %v1854_v55, %v1850_v44 }
 0xbf6   : > { %v1857_v60 = vmul.f32 %v1855_v56, %v1835_v43  ;;  %v1863_v9 = vsub.f32 1.0, %v1855_v56  ;;  %v1869_v3 = vmul.f32 %v1855_v56, %v3596_v21 }
 0xbf8   : > { %v1861_v61 = vadd.f32 %v1859_v63, %v1857_v60 }
 0xbfa   : > { %2571 = vtanh.f32 %v1861_v61 }
 0xc00   : > { %v2572_v1 = vpop.eup %2571 }
 0xc01   : > { %1865 = vrot.lane.b32.xlu2 %v2572_v1, %s2987_s21 }
 0xc5b   : > { %v1866_v2 = vpop.permute.xlu2 %1865 }
 0xc5c   : > { %v1868_v4 = vmul.f32 %v1866_v2, %v1863_v9  ;;  %v2041_v9 = vrot.slane %v3482_v41, 1 }
 0xc5e   : > { %v3611_v8 = vadd.f32 %v1869_v3, %v1868_v4 }
 0xc60   : > { %v1872_v58 = vperm.slane %v3611_v8, 0 }
 0xc62   : > { %1873 = vrot.lane.b32.xlu0 %v1872_v58, %s2987_s21 }
 0xcd4   : > { %v1874_v10 = vpop.permute.xlu0 %1873 }
 0xcd5   : > { %1876 = vst.msk [vmem:[#allocation6 + $0x5] sm:$0x1] %vm1414_vm14, %v1874_v10  ;;  %2370 = vmatmul.msk.f32.vlgmr.msrb.gmra.mxu1 %vm1300_vm9, %v1874_v10  ;;  %2371 = vmatmul.msk.f32.vlgmr.msra.gmra.mxu2 %vm1300_vm9, %v1874_v10 }
 0xd52   : > { %v1905_v34 = vpop.f32.mrf.mxu1 }
 0xd53   : > { %v1906_v11 = vadd.f32 %v1905_v34, %v3467_v45 }
 0xd55   : > { %v1928_v12 = vadd.f32 %v1906_v11, %v3480_v40 }
 0xd57   : > { %v2372_v13 = vmul.f32 -1.442695, %v1928_v12 }
 0xd58   : > { %v1925_v39 = vpop.f32.mrf.mxu2 }
 0xd59   : > { %2573 = vpow2.f32 %v2372_v13  ;;  %v1926_v48 = vadd.f32 %v1925_v39, %v3484_v50  ;;  %v2107_v39 = vld [vmem:[%s3774_s27 + $0x10] sm:$0xff] }
 0xd5f   : > { %v2574_v14 = vpop.eup %2573 }
 0xd60   : > { %v1932_v15 = vadd.f32 1.0, %v2574_v14  ;;  %v2073_v14 = vld [vmem:[%s3773_s11 + $0x18] sm:$0xff] }
 0xd62   : > { %2575 = vrcp.f32 %v1932_v15  ;;  %v1944_v36 = vand.u32 2147483648, %v1932_v15  ;;  %v1942_v38 = vand.u32 2147483647, %v1932_v15  ;;  %vm1938_vm8 = vweird.f32 %v1932_v15 }
 0xd64   : > { %v1945_v47 = vor.u32 1.1754944e-38, %v1944_v36  ;;  %vm1943_vm11 = vcmp.eq.f32.partialorder %v1942_v38, 8.507059e+37  ;;  %v2108_v38 = vld [vmem:[%s3774_s27 + $0x18] sm:$0xff] }
 0xd65   : > { %2128 = vmatpush.msrb.mxu2 %v2108_v38 }
 0xd67   : > { %2129 = vmatpush.msrb.mxu2 %v2107_v39 }
 0xd68   : > { %v2576_v17 = vpop.eup %2575 }
 0xd69   : > { %v1934_v0 = vmul.f32 %v2576_v17, %v1932_v15  ;;  %vm1939_vm7 = vweird.f32 %v2576_v17 }
 0xd6a   : > { %vm1940_vm10 = vmor %vm1938_vm8, %vm1939_vm7 }
 0xd6b   : > { %v1935_v35 = vsub.f32 1.0, %v1934_v0  ;;  %v2071_v0 = vld [vmem:[%s3773_s11 + $0x8] sm:$0xff] }
 0xd6d   : > { %v1936_v37 = vmul.f32 %v2576_v17, %v1935_v35 }
 0xd6f   : > { %v1937_v46 = vadd.f32 %v2576_v17, %v1936_v37  ;;  %v2070_v37 = vld [vmem:[%s3773_s11] sm:$0xff] }
 0xd71   : > { %v1941_v52 = vsel %vm1940_vm10, %v2576_v17, %v1937_v46  ;;  %v2072_v17 = vld [vmem:[%s3773_s11 + $0x10] sm:$0xff]  ;;  %v2106_v46 = vld [vmem:[%s3774_s27 + $0x8] sm:$0xff] }
 0xd72   : > { %v1946_v18 = vsel %vm1943_vm11, %v1945_v47, %v1941_v52  ;;  %2130 = vmatpush.msrb.mxu2 %v2106_v46 }
 0xd73   : > { %v1948_v19 = vmul.f32 %v1946_v18, %v1926_v48  ;;  %v1954_v24 = vsub.f32 1.0, %v1946_v18  ;;  %v1960_v26 = vmul.f32 %v1946_v18, %v3611_v8  ;;  %v2075_v8 = vld [vmem:[%s3773_s11 + $0x28] sm:$0xff]  ;;  %v2105_v18 = vld [vmem:[%s3774_s27] sm:$0xff] }
 0xd74   : > { %2131 = vmatpush.msrb.mxu2 %v2105_v18 }
 0xd75   : > { %v1952_v23 = vadd.f32 %v1950_v20, %v1948_v19  ;;  %v2535_v19 = vld [vmem:[#allocation22] ss:$0 sm:$0xff] }
 0xd77   : > { %2577 = vtanh.f32 %v1952_v23 }
 0xd7d   : > { %v2578_v16 = vpop.eup %2577 }
 0xd7e   : > { %1956 = vrot.lane.b32.xlu1 %v2578_v16, %s2987_s21  ;;  %v2536_v16 = vld [vmem:[#allocation24] ss:$0 sm:$0xff] }
 0xd86   : > { %1416 = vrot.lane.b32.xlu1 %v1410_v7, %s2988_s26 }
 0xd8e   : > { %1695 = vrot.lane.b32.xlu1 %v1690_v42, %s2988_s26 }
 0xdf0   : > { %v1957_v25 = vpop.permute.xlu1 %1956 }
 0xdf1   : > { %v1959_v27 = vmul.f32 %v1957_v25, %v1954_v24 }
 0xdf3   : > { %v1961_v28 = vadd.f32 %v1960_v26, %v1959_v27 }
 0xdf5   : > { %v1963_v40 = vperm.slane %v1961_v28, 0 }
 0xdf7   : > { %1968 = vrot.lane.b32.xlu1 %v1963_v40, %s2988_s26  ;;  %1964 = vrot.lane.b32.xlu2 %v1963_v40, %s2987_s21 }
 0xdf8   : > { %v1417_v29 = vpop.permute.xlu1 %1416 }
 0xdf9   : > { %1419 = vst.msk [vmem:[#allocation7 + $0x7] sm:$0x1] %vm1414_vm14, %v1417_v29 }
 0xdff   : > { %1509 = vrot.lane.b32.xlu2 %v1504_v59, %s2988_s26 }
 0xe00   : > { %v1696_v5 = vpop.permute.xlu1 %1695 }
 0xe01   : > { %1698 = vst.msk [vmem:[#allocation7 + $0x4] sm:$0x1] %vm1414_vm14, %v1696_v5 }
 0xe07   : > { %1786 = vrot.lane.b32.xlu2 %v1781_v22, %s2988_s26 }
 0xe51   : > { %v1965_v7 = vpop.permute.xlu2 %1964 }
 0xe52   : > { %1967 = vst.msk [vmem:[#allocation6 + $0x6] sm:$0x1] %vm1414_vm14, %v1965_v7  ;;  %2373 = vmatmul.msk.f32.vlgmr.msra.gmra.mxu3 %vm1300_vm9, %v1965_v7  ;;  %2374 = vmatmul.msk.f32.vlgmr.msrb.gmra.mxu0 %vm1300_vm9, %v1965_v7 }
 0xe59   : > { %v1510_v62 = vpop.permute.xlu2 %1509 }
 0xe5a   : > { %1512 = vst.msk [vmem:[#allocation7 + $0x6] sm:$0x1] %vm1414_vm14, %v1510_v62 }
 0xe61   : > { %v1787_v42 = vpop.permute.xlu2 %1786 }
 0xe62   : > { %1789 = vst.msk [vmem:[#allocation7 + $0x3] sm:$0x1] %vm1414_vm14, %v1787_v42 }
 0xe69   : > { %v1969_v57 = vpop.permute.xlu1 %1968 }
 0xe6a   : > { %1971 = vst.msk [vmem:[#allocation7 + $0x1] sm:$0x1] %vm1414_vm14, %v1969_v57 }
 0xecf   : > { %v2016_v44 = vpop.f32.mrf.mxu0 }
 0xed5   : > { %v1996_v59 = vpop.f32.mrf.mxu3 }
 0xed6   : > { %v1997_v21 = vadd.f32 %v1996_v59, %v3467_v45  ;;  %v2017_v45 = vadd.f32 %v2016_v44, %v3484_v50 }
 0xed8   : > { %v2019_v22 = vadd.f32 %v1997_v21, %v3482_v41 }
 0xeda   : > { %v2375_v30 = vmul.f32 -1.442695, %v2019_v22 }
 0xedc   : > { %2579 = vpow2.f32 %v2375_v30 }
 0xee2   : > { %v2580_v31 = vpop.eup %2579 }
 0xee3   : > { %v2023_v32 = vadd.f32 1.0, %v2580_v31 }
 0xee5   : > { %2581 = vrcp.f32 %v2023_v32  ;;  %v2035_v54 = vand.u32 2147483648, %v2023_v32  ;;  %v2033_v43 = vand.u32 2147483647, %v2023_v32  ;;  %vm2029_vm13 = vweird.f32 %v2023_v32 }
 0xee7   : > { %v2036_v60 = vor.u32 1.1754944e-38, %v2035_v54  ;;  %vm2034_vm0 = vcmp.eq.f32.partialorder %v2033_v43, 8.507059e+37 }
 0xeeb   : > { %v2582_v33 = vpop.eup %2581 }
 0xeec   : > { %v2025_v6 = vmul.f32 %v2582_v33, %v2023_v32  ;;  %vm2030_vm12 = vweird.f32 %v2582_v33 }
 0xeed   : > { %vm2031_vm15 = vmor %vm2029_vm13, %vm2030_vm12 }
 0xeee   : > { %v2026_v53 = vsub.f32 1.0, %v2025_v6 }
 0xef0   : > { %v2027_v55 = vmul.f32 %v2582_v33, %v2026_v53 }
 0xef2   : > { %v2028_v56 = vadd.f32 %v2582_v33, %v2027_v55 }
 0xef4   : > { %v2032_v63 = vsel %vm2031_vm15, %v2582_v33, %v2028_v56 }
 0xef5   : > { %v2037_v61 = vsel %vm2034_vm0, %v2036_v60, %v2032_v63 }
 0xef6   : > { %v2039_v1 = vmul.f32 %v2037_v61, %v2017_v45  ;;  %v2045_v50 = vsub.f32 1.0, %v2037_v61  ;;  %v2051_v10 = vmul.f32 %v2037_v61, %v1961_v28 }
 0xef8   : > { %v2043_v2 = vadd.f32 %v2041_v9, %v2039_v1 }
 0xefa   : > { %2583 = vtanh.f32 %v2043_v2 }
 0xf00   : > { %v2584_v3 = vpop.eup %2583 }
 0xf01   : > { %2047 = vrot.lane.b32.xlu0 %v2584_v3, %s2987_s21 }
 0xf09   : > { %1602 = vrot.lane.b32.xlu0 %v1597_v51, %s2988_s26  ;;  %v2076_v51 = vld [vmem:[%s3773_s11 + $0x30] sm:$0xff] }
 0xf0a   : > { %2094 = vmatpush.msra.mxu1 %v2076_v51 }
 0xf0c   : > { %2095 = vmatpush.msra.mxu1 %v2075_v8 }
 0xf11   : > { %1877 = vrot.lane.b32.xlu0 %v1872_v58, %s2988_s26  ;;  %v2074_v58 = vld [vmem:[%s3773_s11 + $0x20] sm:$0xff] }
 0xf12   : > { %2096 = vmatpush.msra.mxu1 %v2074_v58 }
 0xf14   : > { %2097 = vmatpush.msra.mxu1 %v2073_v14 }
 0xf16   : > { %2098 = vmatpush.msra.mxu1 %v2072_v17 }
 0xf18   : > { %2099 = vmatpush.msra.mxu1 %v2071_v0 }
 0xf1a   : > { %2100 = vmatpush.msra.mxu1 %v2070_v37 }
 0xf73   : > { %v2048_v4 = vpop.permute.xlu0 %2047 }
 0xf74   : > { %v2050_v34 = vmul.f32 %v2048_v4, %v2045_v50 }
 0xf76   : > { %v2052_v11 = vadd.f32 %v2051_v10, %v2050_v34 }
 0xf78   : > { %v2054_v12 = vperm.slane %v2052_v11, 0 }
 0xf7a   : > { %2055 = vrot.lane.b32.xlu0 %v2054_v12, %s2987_s21  ;;  %2059 = vrot.lane.b32.xlu2 %v2054_v12, %s2988_s26 }
 0xf7b   : > { %v1603_v41 = vpop.permute.xlu0 %1602 }
 0xf7c   : > { %1605 = vst.msk [vmem:[#allocation7 + $0x5] sm:$0x1] %vm1414_vm14, %v1603_v41 }
 0xf83   : > { %v1878_v13 = vpop.permute.xlu0 %1877 }
 0xf84   : > { %1880 = vst.msk [vmem:[#allocation7 + $0x2] sm:$0x1] %vm1414_vm14, %v1878_v13 }
 0xfd4   : > { %v2060_v15 = vpop.permute.xlu2 %2059 }
 0xfd5   : > { %2062 = vst.msk [vmem:[#allocation7] sm:$0x1] %vm1414_vm14, %v2060_v15 }
 0xfdc   : > { %v2064_v35 = vld [vmem:[#allocation7] sm:$0xff] }
 0xfdd   : > { %2066 = vrot.lane.b32.xlu1 %v2064_v35, %s2988_s26 }
 0xfec   : > { %v2056_v36 = vpop.permute.xlu0 %2055 }
 0xfed   : > { %2058 = vst.msk [vmem:[#allocation6 + $0x7] sm:$0x1] %vm1414_vm14, %v2056_v36 }
 0xff4   : > { %v2063_v48 = vld [vmem:[#allocation6] sm:$0xff] }
0x104f   : > { %v2067_v47 = vpop.permute.xlu1 %2066 }
0x1050   : > { %v2069_v52 = vsel %vm1008_vm5, %v2063_v48, %v2067_v47 }
0x1051   : > { %2376 = vmatmul.msk.f32.vlgmr.msra.gmra.mxu1 %vm1300_vm9, %v2069_v52  ;;  %vm2136_vm9 = vcmask 39936  }
0x10ce   : > { %v2102_v20 = vpop.f32.mrf.mxu1 }
0x10cf   : > { %v2103_v23 = vadd.f32 %v2535_v19, %v2102_v20 }
0x10d1   : > { %2377 = vmatmul.msk.f32.vlgmr.msrb.gmra.mxu2 %vm1008_vm5, %v2103_v23 }
0x1154   : > { %v2133_v24 = vpop.f32.mrf.mxu2 }
0x1155   : > { %v2134_v25 = vadd.f32 %v2536_v16, %v2133_v24 }
0x1157   : > { %2137 = vst.msk [vmem:[%s770_s0] sm:$0xff] %vm2136_vm9, %v2134_v25 }
0x1158 PF: > { %p34_p3 = scmp.ge.s32.totalorder %s3187_s15, 4   ;;  %s3776_s0 = smov %s2961_s30 }
0x1159   : > { %s3777_s30 = smov %s2965_s20  ;;  %s3778_s20 = smov %s3198_s23 }
0x115a   : > { %s3779_s21 = smov %s3187_s15  ;;  %36 = sbr.rel (!%p34_p3) target bundleno = 21 (0x15), region = 189 }
0x115f   :  { %2157 = vsyncpa [#allocation9], 1 }
0x1160   :  { %2159 = vsyncpa [#allocation9 + $0x1], 1 }
0x1161   :  { %2160 = vsyncpa [#allocation11], 1 }
0x1162   :  { %2161 = vsyncpa [#allocation14], 1 }
0x1163   :  { %2162 = vsyncpa [#allocation17], 1 }
0x1164   :  { %2163 = vsyncpa [#allocation20], 1 }
0x1165   :  { %2164 = vsyncpa [#allocation23], 1 }

</bundles_post_ra>
